<compile_context>
chip_gen: v6e
topology: v6e:2x2x1
jax: 0.10.0
libtpu: 0.0.40
codegen_flags: <defaults>
</compile_context>

<pallas_src>
import functools

import jax
import jax.numpy as jnp
from jax.experimental import pallas as pl
from jax.experimental.pallas import tpu as pltpu

EPS = 1e-6
_LANE = 128


def _cdiv(a, b):
    return -(-a // b)


def _round_up(a, m):
    return _cdiv(a, m) * m


def gem_kernel(scal_ref, x_ref, o_ref, acc_ref, *, n_total, nt, ragged_n):
    # scal_ref : (3,) f32 SMEM  -> [p, 1/p, 1/N]
    # x_ref    : (bt, dt, nt) VMEM input tile (N on lanes, D on sublanes)
    # o_ref    : (bt, dt)     VMEM output tile (resident across the N grid axis)
    # acc_ref  : (bt, dt, al) f32 VMEM scratch accumulator, al = min(nt, 128)
    n = pl.program_id(2)

    @pl.when(n == 0)
    def _():
        acc_ref[...] = jnp.zeros_like(acc_ref)

    p = scal_ref[0]
    # Keep the pow path in f32 (v5e EUP/VPU have no bf16; correct on all gens).
    x = x_ref[...].astype(jnp.float32)            # (bt, dt, nt)
    xc = jnp.maximum(x, EPS)                      # clamp(min=eps)          (VPU)
    xp = jnp.exp(jnp.log(xc) * p)                 # x ** p                  (EUP)
    # TODO(synk): on v7x (or bf16 inputs) the two EUP pushes per element may bind
    # before HBM; a bf16 log/exp variant (accumulating in f32) is the next lever.

    if ragged_n:
        # cdiv-padded grid: zero lanes past the true N so the mean stays exact.
        idx = jax.lax.broadcasted_iota(jnp.int32, xp.shape, 2) + n * nt
        xp = jnp.where(idx < n_total, xp, 0.0)

    # Hot-loop accumulate: lane-group-aligned VPU adds only.  The XLU cross-lane
    # reduce and the (D: sublane -> lane) relayout are deferred to the finalize.
    al = acc_ref.shape[-1]
    part = xp[:, :, 0:al]
    for g in range(1, nt // al):
        part = part + xp[:, :, g * al:(g + 1) * al]
    acc_ref[...] += part

    @pl.when(n == pl.num_programs(2) - 1)
    def _():
        inv_p = scal_ref[1]
        inv_n = scal_ref[2]
        s = jnp.sum(acc_ref[...], axis=-1)        # one XLU lane reduce, once
        m = s * inv_n                             # mean over N
        o_ref[...] = jnp.exp(jnp.log(m) * inv_p).astype(o_ref.dtype)


def _vmem_limit_bytes():
    cap = 64 * 1024 * 1024                        # conservative fallback = v7x VMEM
    try:
        cap = int(getattr(pltpu.get_tpu_info(), "vmem_capacity_bytes", cap))
    except Exception:
        pass
    # ~70% of physical, capped at 96 MiB (v5e/v6e ~90-96 MiB, v7x ~45 MiB).
    return min(int(cap * 0.70), 96 * 1024 * 1024)


def _pick_tiles(B, D, N, in_itemsize, out_itemsize, budget_bytes, dt_cap, nt_cap):
    """Largest (bt, dt, nt) whose double-buffered input tile + f32 temporaries +
    accumulator fit in `budget_bytes`.  nt (contiguous HBM axis) is maximized
    first; dt (the strided axis) is what shrinks."""
    bt = min(B, 8)

    if D <= _LANE:
        d_opts = [D]
    else:
        hi = min(_round_up(D, _LANE), max(_LANE, (dt_cap // _LANE) * _LANE))
        d_opts = list(range(_LANE, hi + 1, _LANE))

    if N <= _LANE:
        n_opts = [N]
    else:
        hi = min(_round_up(N, _LANE), max(_LANE, (nt_cap // _LANE) * _LANE))
        n_opts = list(range(_LANE, hi + 1, _LANE))

    def vmem_use(dt, nt):
        elems = bt * dt * nt
        in_buf = 2 * elems * in_itemsize          # double-buffered input tile
        f32_tmp = 2 * elems * 4                   # astype(f32)/clamp + x**p live values
        acc = bt * dt * min(nt, _LANE) * 4        # f32 accumulator scratch
        out_buf = 2 * bt * dt * out_itemsize
        return in_buf + f32_tmp + acc + out_buf

    nt = max([n for n in n_opts if vmem_use(d_opts[0], n) <= budget_bytes]
             or [n_opts[0]])
    dt = max([d for d in d_opts if vmem_use(d, nt) <= budget_bytes]
             or [d_opts[0]])

    # v7x has 2 TensorCores: ensure >= 2 parallel (b, d) tiles when possible so
    # the EUP-heavy pow work is split instead of running serially on one core.
    if _cdiv(B, bt) * _cdiv(D, dt) < 2 and dt > _LANE:
        dt = max(_LANE, _round_up(_cdiv(D, 2), _LANE))

    return bt, dt, nt


def gem(x, p, *, dt_cap=512, nt_cap=2048):
    """x: (B, D, N, 1) array (PyTorch layout), p: scalar / (1,) exponent.
    Returns (B, D) = (mean_N clamp(x, eps)**p) ** (1/p)."""
    B, D, N, one = x.shape
    assert one == 1
    x3 = x[..., 0]                                # (B, D, N): free singleton drop

    vmem_limit = _vmem_limit_bytes()
    budget = int(0.60 * vmem_limit)               # headroom for pipeline/compiler
    bt, dt, nt = _pick_tiles(B, D, N, x.dtype.itemsize, x.dtype.itemsize,
                             budget, dt_cap, nt_cap)
    grid = (_cdiv(B, bt), _cdiv(D, dt), _cdiv(N, nt))
    ragged_n = (N % nt) != 0

    # Scalars hoisted out of the per-element path: p, 1/p, and the 1/N mean scale.
    p0 = jnp.asarray(p, jnp.float32).reshape(())
    scal = jnp.stack([p0, 1.0 / p0, jnp.asarray(1.0 / N, jnp.float32)])

    kernel = functools.partial(gem_kernel, n_total=N, nt=nt, ragged_n=ragged_n)

    out = pl.pallas_call(
        kernel,
        out_shape=jax.ShapeDtypeStruct((B, D), x.dtype),
        grid=grid,
        in_specs=[
            pl.BlockSpec(memory_space=pltpu.MemorySpace.SMEM),        # [p, 1/p, 1/N]
            pl.BlockSpec((bt, dt, nt), lambda b, d, n: (b, d, n)),    # x tile
        ],
        out_specs=pl.BlockSpec((bt, dt), lambda b, d, n: (b, d)),     # pooled rows
        scratch_shapes=[pltpu.VMEM((bt, dt, min(nt, _LANE)), jnp.float32)],
        compiler_params=pltpu.CompilerParams(
            # B/D tiles shard across TensorCores; N is the reduction (innermost).
            dimension_semantics=("parallel", "parallel", "arbitrary"),
            vmem_limit_bytes=vmem_limit,
        ),
    )(scal, x3)
    return out  # (B, D)


def _gem_ref(x, p):
    p0 = jnp.asarray(p, jnp.float32).reshape(())
    xp = jnp.power(jnp.maximum(x.astype(jnp.float32), EPS), p0)
    m = jnp.mean(xp, axis=-2)
    return jnp.power(m, 1.0 / p0)[..., 0].astype(x.dtype)


if __name__ == "__main__":
    key = jax.random.PRNGKey(0)
    k1, k2 = jax.random.split(key)
    p = jnp.ones((1,), dtype=jnp.float32) * 3.0   # nn.Parameter(torch.ones(1) * 3)

    # Test 1: multi-step N reduction (grid = (1, 2, 3)); exercises accumulator
    # init/finalize gating and the >= 2 parallel-D-tiles split.
    B, D, N = 2, 256, 384
    x = jax.random.normal(k1, (B, D, N, 1), dtype=jnp.float32)
    out = gem(x, p, nt_cap=128)
    jax.block_until_ready(out)
    ref = _gem_ref(x, p)
    assert out.shape == (B, D)
    assert jnp.allclose(out, ref, atol=1e-5, rtol=1e-4), \
        float(jnp.max(jnp.abs(out - ref)))

    # Test 2: ragged N (200 = 128 + 72) exercising the cdiv-padded grid and the
    # in-kernel lane mask over the N tail (no full-dim fallback / VMEM blow-up).
    B2, D2, N2 = 2, 128, 200
    x2 = jax.random.normal(k2, (B2, D2, N2, 1), dtype=jnp.float32)
    out2 = gem(x2, p, nt_cap=128)
    jax.block_until_ready(out2)
    ref2 = _gem_ref(x2, p)
    assert out2.shape == (B2, D2)
    assert jnp.allclose(out2, ref2, atol=1e-5, rtol=1e-4), \
        float(jnp.max(jnp.abs(out2 - ref2)))

    print("KERNEL_OK")
</pallas_src>

<mosaic_0001>
module attributes {stable_mosaic.version = 11 : i64} {
  func.func @gem_kernel(%arg0: i32, %arg1: i32, %arg2: i32, %arg3: memref<3xf32, #tpu.memory_space<smem>>, %arg4: memref<2x128x128xf32, #tpu.memory_space<vmem>>, %arg5: memref<2x128xf32, #tpu.memory_space<vmem>>, %arg6: memref<2x128x128xf32, #tpu.memory_space<vmem>>) attributes {dimension_semantics = [#tpu.dimension_semantics<parallel>, #tpu.dimension_semantics<parallel>, #tpu.dimension_semantics<arbitrary>], iteration_bounds = array<i64: 1, 2, 3>, scalar_prefetch = 0 : i64, scratch_operands = 1 : i64, tpu.core_type = #tpu.core_type<tc>, window_params = [{transform_indices = @transform_0, window_bounds = array<i64: 3>}, {transform_indices = @transform_1, window_bounds = array<i64: 2, 128, 128>}, {transform_indices = @transform_2, window_bounds = array<i64: 2, 128>}]} {
    %c0_i32 = arith.constant 0 : i32
    %0 = arith.cmpi eq, %arg2, %c0_i32 : i32
    %1 = arith.extui %0 : i1 to i32
    %c0_i32_0 = arith.constant 0 : i32
    %2 = arith.cmpi ne, %1, %c0_i32_0 : i32
    scf.if %2 {
      %cst_11 = arith.constant 0.000000e+00 : f32
      %17 = vector.broadcast %cst_11 : f32 to vector<2x128x128xf32>
      %c0_12 = arith.constant 0 : index
      %c0_13 = arith.constant 0 : index
      %c0_14 = arith.constant 0 : index
      %18 = vector.load %arg6[%c0_12, %c0_13, %c0_14] : memref<2x128x128xf32, #tpu.memory_space<vmem>>, vector<2x128x128xf32>
      tpu.vector_store %arg6[%c0_12, %c0_13, %c0_14], %17 {strides = array<i32>} : memref<2x128x128xf32, #tpu.memory_space<vmem>>, vector<2x128x128xf32>,
    } else {
    }
    %c0 = arith.constant 0 : index
    %3 = memref.load %arg3[%c0] : memref<3xf32, #tpu.memory_space<smem>>
    %c0_1 = arith.constant 0 : index
    %c0_2 = arith.constant 0 : index
    %c0_3 = arith.constant 0 : index
    %4 = vector.load %arg4[%c0_1, %c0_2, %c0_3] : memref<2x128x128xf32, #tpu.memory_space<vmem>>, vector<2x128x128xf32>
    %cst = arith.constant 9.99999997E-7 : f32
    %5 = vector.broadcast %cst : f32 to vector<2x128x128xf32>
    %6 = arith.maximumf %4, %5 : vector<2x128x128xf32>
    %7 = math.log %6 : vector<2x128x128xf32>
    %8 = vector.broadcast %3 : f32 to vector<2x128x128xf32>
    %9 = arith.mulf %7, %8 : vector<2x128x128xf32>
    %10 = math.exp %9 : vector<2x128x128xf32>
    %c0_4 = arith.constant 0 : index
    %c0_5 = arith.constant 0 : index
    %c0_6 = arith.constant 0 : index
    %11 = vector.load %arg6[%c0_4, %c0_5, %c0_6] : memref<2x128x128xf32, #tpu.memory_space<vmem>>, vector<2x128x128xf32>
    %12 = arith.addf %11, %10 : vector<2x128x128xf32>
    %c0_7 = arith.constant 0 : index
    %c0_8 = arith.constant 0 : index
    %c0_9 = arith.constant 0 : index
    %13 = vector.load %arg6[%c0_7, %c0_8, %c0_9] : memref<2x128x128xf32, #tpu.memory_space<vmem>>, vector<2x128x128xf32>
    tpu.vector_store %arg6[%c0_7, %c0_8, %c0_9], %12 {strides = array<i32>} : memref<2x128x128xf32, #tpu.memory_space<vmem>>, vector<2x128x128xf32>,
    %c2_i32 = arith.constant 2 : i32
    %14 = arith.cmpi eq, %arg2, %c2_i32 : i32
    %15 = arith.extui %14 : i1 to i32
    %c0_i32_10 = arith.constant 0 : i32
    %16 = arith.cmpi ne, %15, %c0_i32_10 : i32
    scf.if %16 {
      %c1 = arith.constant 1 : index
      %17 = memref.load %arg3[%c1] : memref<3xf32, #tpu.memory_space<smem>>
      %c2 = arith.constant 2 : index
      %18 = memref.load %arg3[%c2] : memref<3xf32, #tpu.memory_space<smem>>
      %c0_11 = arith.constant 0 : index
      %c0_12 = arith.constant 0 : index
      %c0_13 = arith.constant 0 : index
      %19 = vector.load %arg6[%c0_11, %c0_12, %c0_13] : memref<2x128x128xf32, #tpu.memory_space<vmem>>, vector<2x128x128xf32>
      %cst_14 = arith.constant dense<0.000000e+00> : vector<2x128xf32>
      %20 = vector.multi_reduction <add>, %19, %cst_14 [2] : vector<2x128x128xf32> to vector<2x128xf32>
      %21 = vector.broadcast %18 : f32 to vector<2x128xf32>
      %22 = arith.mulf %20, %21 : vector<2x128xf32>
      %23 = math.log %22 : vector<2x128xf32>
      %24 = vector.broadcast %17 : f32 to vector<2x128xf32>
      %25 = arith.mulf %23, %24 : vector<2x128xf32>
      %26 = math.exp %25 : vector<2x128xf32>
      %c0_15 = arith.constant 0 : index
      %c0_16 = arith.constant 0 : index
      %27 = vector.load %arg5[%c0_15, %c0_16] : memref<2x128xf32, #tpu.memory_space<vmem>>, vector<2x128xf32>
      tpu.vector_store %arg5[%c0_15, %c0_16], %26 {strides = array<i32>} : memref<2x128xf32, #tpu.memory_space<vmem>>, vector<2x128xf32>,
    } else {
    }
    return
  }
  func.func @transform_0(%arg0: i32, %arg1: i32, %arg2: i32) -> i32 {
    %c0_i32 = arith.constant 0 : i32
    %c0_i32_0 = arith.constant 0 : i32
    return %c0_i32 : i32
  }
  func.func @transform_1(%arg0: i32, %arg1: i32, %arg2: i32) -> (i32, i32, i32) {
    %c0_i32 = arith.constant 0 : i32
    return %arg0, %arg1, %arg2 : i32, i32, i32
  }
  func.func @transform_2(%arg0: i32, %arg1: i32, %arg2: i32) -> (i32, i32) {
    %c0_i32 = arith.constant 0 : i32
    return %arg0, %arg1 : i32, i32
  }
}

</mosaic_0001>

<bundles_post_ra>
// kernel: tpu_custom_call.1
= control target key start
LH: loop header
LB: loop body
LE: loop exit
PB: predicated region body
PF: predicated region fallthrough
CT: control target
= control target key end

     0   :  { %s2334_s0 = inlined_call_operand.hbm [shape: f32[3], index: 0, kind: input, shape index: {}]   ;;  %s2335_s1 = inlined_call_operand.hbm [shape: f32[2,256,384], index: 1, kind: input, shape index: {}]   ;;  %s2336_s2 = inlined_call_operand.hbm [shape: f32[2,256], index: 2, kind: output, shape index: {}]  }
   0x1   :  { %2340 = sst [smem:[#allocation20_spill]] %s2334_s0 }
   0x2   :  { %7 = vsyncpa [#allocation6], 0 }
   0x3   :  { %8 = vsyncpa [#allocation4], 0 }
   0x4   :  { %10 = vsyncpa [#allocation4 + $0x1], 0 }
   0x5   :  { %11 = vsyncpa [#allocation5], 0 }
   0x6   :  { %13 = vsyncpa [#allocation5 + $0x1], 0  ;;  %s1794_s9 = smov 0   ;;  %s1796_s10 = smov 0  }
   0x7   :  { %s1798_s11 = smov 0   ;;  %s1800_s12 = smov 0  }
   0x8   :  { %s1802_s13 = smov 0   ;;  %s1804_s14 = smov 0  }
   0x9   :  { %s1806_s15 = smov 0   ;;  %s1808_s16 = smov 0  }
   0xa   :  { %s1810_s17 = smov 0   ;;  %s1812_s18 = smov 0  }
   0xb   :  { %s1814_s19 = smov 0  }
   0xc LB: > { %2341 = sst [smem:[#allocation15_spill]] %s1763_s18  ;;  %s1229_s20 = sadd.s32 4294967295, %s1767_s19   ;;  %s1767_s19 = sphi %s1814_s19, %s19_s19   ;;  %s1763_s18 = sphi %s1812_s18, %s2357_s18   ;;  %s1759_s17 = sphi %s1810_s17, %s2365_s17   ;;  %s1755_s16 = sphi %s1808_s16, %s2355_s16   ;;  %s1751_s15 = sphi %s1806_s15, %s2364_s15   ;;  %s1747_s14 = sphi %s1804_s14, %s2363_s14   ;;  %s1743_s13 = sphi %s1802_s13, %s2362_s13   ;;  %s1739_s12 = sphi %s1800_s12, %s2361_s12   ;;  %s1735_s11 = sphi %s1798_s11, %s2360_s11   ;;  %s1731_s10 = sphi %s1796_s10, %s2359_s10   ;;  %s1727_s9 = sphi %s1794_s9, %s2358_s9  }
   0xd   : > { %s1230_s21 = sadd.s32 4294967294, %s1767_s19   ;;  %s31_s22 = sadd.s32 1, %s1759_s17 }
   0xe   : > { %s34_s23 = sadd.s32 1, %s1763_s18  ;;  %p32_p0 = scmp.ge.s32.totalorder %s31_s22, 3 }
   0xf   : > { %s70_s24 = sadd.s32 1, %s1747_s14  ;;  %p77_p1 = scmp.ne.s32.totalorder %s1747_s14, %s1743_s13 }
  0x10   : > { %p78_p2 = scmp.eq.s32.totalorder %s1767_s19, 0  ;;  %s2367_s22 = smov (%p32_p0, %s31_s22), 0 }
  0x11   : > { %2342 = sst [smem:[#allocation16_spill]] %s2367_s22  ;;  %s2369_s23 = smov (!%p32_p0, %s34_s23), %s1763_s18 }
  0x12   : > { %s66_s25 = ssub.s32 %s1759_s17, %s2367_s22  ;;  %p1860_p3 = por %p78_p2, %p77_p1 }
  0x13   : > { %p36_p4 = scmp.ge.s32.totalorder %s2369_s23, 2  ;;  %p83_p5 = scmp.ne.s32.totalorder %s1743_s13, %s1739_s12 }
  0x14   : > { %p1865_p6 = scmp.eq.s32.totalorder %s1229_s20, 0  ;;  %s98_s28 = sadd.s32 1, %s1735_s11 }
  0x15   : > { %s2371_s23 = smov (%p36_p4, %s2369_s23), 0  ;;  %p108_p8 = scmp.ne.s32.totalorder %s1735_s11, %s1731_s10 }
  0x16   : > { %2345 = sst [smem:[#allocation17_spill]] %s2371_s23  ;;  %p1874_p7 = por %p1865_p6, %p83_p5 }
  0x17   : > { %s64_s30 = ssub.s32 %s1763_s18, %s2371_s23  ;;  %p109_p9 = scmp.eq.s32.totalorder %s1229_s20, 5 }
  0x18   : > { %s67_s3 = sor.u32 %s66_s25, %s64_s30  ;;  %p96_p10 = scmp.eq.s32.totalorder %s64_s30, 0 }
  0x19   : > { %p68_p11 = scmp.eq.s32.totalorder %s67_s3, 0  ;;  %p1882_p12 = por %p109_p9, %p108_p8 }
  0x1a   : > { %s1887_s5 = scalar_select %p96_p10, %s1735_s11, %s98_s28  }
  0x1b   : > { %s1890_s6 = scalar_select %p68_p11, %s1747_s14, %s70_s24  }
  0x1c   : > { %2348 = sst [smem:[#allocation18_spill]] %s1887_s5  ;;  %p114_p13 = scmp.ne.s32.totalorder %s1731_s10, %s1727_s9 }
  0x1d   : > { %2349 = sst [smem:[#allocation19_spill]] %s1890_s6  ;;  %p115_p0 = scmp.eq.s32.totalorder %s1230_s21, 5 }
  0x1e   : > { %p1231_p1 = scmp.ge.s32.totalorder %s1767_s19, 1  ;;  %p122_p2 = scmp.lt.s32.totalorder %s1767_s19, 7 }
  0x1f   : > { %p1896_p4 = por %p115_p0, %p114_p13  ;;  %s1769_s12 = smov [#allocation3]  }
  0x20   : > { %p1900_p5 = pnand %p1231_p1, %p122_p2  ;;  %s2352_s0 = sld [smem:[#allocation20_spill]] }
  0x21   : > { %p1233_p10 = scmp.ge.s32.totalorder %s1767_s19, 6 }
  0x22   : > { %p1268_p8 = pneg %p1900_p5 }
  0x23   : > { %140 = sbr.rel (%p1233_p10) target bundleno = 56 (0x38), region = 20 }
  0x24   : > { %p1269_p9 = pnand %p1268_p8, %p1865_p6 }
  0x26   : > { %1271 = dma.hbm_to_smem (!%p1269_p9), %s2352_s0, 16, %s1769_s12, [#allocation6]  }
  0x28   : > { %s144_s21 = sand.u32 1, %s1747_s14   ;;  %s1252_s25 = smul.u32 48, %s1763_s18 }
  0x29   : > { %s1234_s28 = sshll.u32 %s144_s21, 8  ;;  %s1770_s5 = smov 12288  }
  0x2a   : > { %s155_s30 = sadd.s32 %s1759_s17, %s1252_s25  ;;  %s148_s20 = scalar_lea.vmem [#allocation7], %s1234_s28 }
  0x2b   : > { %s1237_s3 = sshll.u32 %s155_s30, 7  ;;  %s172_s24 = sshll.u32 %s148_s20, 4  ;;  %s173_s24 = int_to_ptr.vmem [resolvable:$true] %s172_s24 }
  0x2c   : > { %s159_s12 = scalar_lea.hbm %s2335_s1, %s1237_s3  ;;  %1256 = sst [smem:[#allocation10]] (%p1860_p3), %s1770_s5 }
  0x2d   : > { %s1255_s0 = scalar_select %p1860_p3, [#allocation0], [#allocation11] }
  0x2e   : > { %s1771_s18 = smov 2048   ;;  %s1772_s25 = smov 16  }
  0x2f   : > { %s164_s6 = sld [smem:[%s1255_s0]]   ;;  %s1773_s22 = smov 384  }
  0x30   : > { %1257 = sst [smem:[#allocation10 + $0x1]] (%p1860_p3), %s1771_s18  ;;  %s1774_s23 = smov 128  }
  0x31   : > { %1258 = sst [smem:[#allocation10 + $0x2]] (%p1860_p3), %s1772_s25  ;;  %s1775_s30 = smov 8  }
  0x32   : > { %1259 = sst [smem:[#allocation10 + $0x3]] (%p1860_p3), %s1773_s22  ;;  %s145_s5 = scalar_lea.sflag [#allocation4], %s144_s21 }
  0x33   : > { %1260 = sst [smem:[#allocation10 + $0x4]] (%p1860_p3), %s1774_s23  ;;  %s1776_s3 = smov 131072  }
  0x34   : > { %1261 = sst [smem:[#allocation10 + $0x5]] (%p1860_p3), %s1775_s30 }
  0x35   : > { %s1238_s28 = sshll.u32 %s164_s6, 26 }
  0x36   : > { %s1239_s0 = sadd.s32 134217728, %s1238_s28 }
  0x37   : > { %1262 = dma.general (%p1860_p3), %s159_s12, 4096, %s173_s24, %s145_s5, %s1776_s3, [#allocation10], %s1239_s0, 0  }
  0x38 PF: > { %197 = sbr.rel (%p1900_p5) target bundleno = 448 (0x1c0), region = 28 }
  0x3d   : > { %1714 = dma.done.wait (%p1865_p6), [#allocation6], 16  }
  0x3e   : > { %1716 = vsyncadd (%p1865_p6), [#allocation6], 4294967280  ;;  %s203_s18 = sand.u32 1, %s1743_s13  }
  0x3f   : > { %s1242_s6 = sshll.u32 %s203_s18, 8  ;;  %s204_s20 = scalar_lea.sflag [#allocation4], %s203_s18 }
  0x40   : > { %s1941_s25 = scalar_lea.vmem [#allocation7], %s1242_s6 }
  0x41   : > { %1718 = dma.done.wait (%p1874_p7), %s204_s20, 4096  }
  0x42   : > { %1720 = vsyncadd (%p1874_p7), %s204_s20, 4294963200 }
  0x43   : > { %212 = sfence }
  0x44   : > { %s226_s26 = sand.u32 1, %s1731_s10   ;;  %p1244_p3 = scmp.ne.s32.totalorder %s1751_s15, 0 }
  0x45   : > { %s1950_s8 = sshll.u32 %s226_s26, 1 }
  0x46   : > { %s228_s27 = scalar_lea.vmem [#allocation8], %s1950_s8  ;;  %234 = sbr.rel (%p1244_p3) target bundleno = 92 (0x5c), region = 40 }
  0x4b   : > { %v1777_v0 = vmov 0.0  }
  0x4c   : > { %235 = vst [vmem:[#allocation2 + $0xb0] sm:$0xff] %v1777_v0  ;;  %236 = vst [vmem:[#allocation2] sm:$0xff] %v1777_v0 }
  0x4d   : > { %237 = vst [vmem:[#allocation2 + $0xd8] sm:$0xff] %v1777_v0  ;;  %238 = vst [vmem:[#allocation2 + $0x18] sm:$0xff] %v1777_v0 }
  0x4e   : > { %239 = vst [vmem:[#allocation2 + $0x50] sm:$0xff] %v1777_v0  ;;  %240 = vst [vmem:[#allocation2 + $0x68] sm:$0xff] %v1777_v0 }
  0x4f   : > { %241 = vst [vmem:[#allocation2 + $0x30] sm:$0xff] %v1777_v0  ;;  %242 = vst [vmem:[#allocation2 + $0x48] sm:$0xff] %v1777_v0 }
  0x50   : > { %243 = vst [vmem:[#allocation2 + $0x80] sm:$0xff] %v1777_v0  ;;  %244 = vst [vmem:[#allocation2 + $0x88] sm:$0xff] %v1777_v0 }
  0x51   : > { %245 = vst [vmem:[#allocation2 + $0xe8] sm:$0xff] %v1777_v0  ;;  %246 = vst [vmem:[#allocation2 + $0xb8] sm:$0xff] %v1777_v0 }
  0x52   : > { %247 = vst [vmem:[#allocation2 + $0x60] sm:$0xff] %v1777_v0  ;;  %248 = vst [vmem:[#allocation2 + $0xf0] sm:$0xff] %v1777_v0 }
  0x53   : > { %249 = vst [vmem:[#allocation2 + $0x8] sm:$0xff] %v1777_v0  ;;  %250 = vst [vmem:[#allocation2 + $0x78] sm:$0xff] %v1777_v0 }
  0x54   : > { %251 = vst [vmem:[#allocation2 + $0x38] sm:$0xff] %v1777_v0  ;;  %252 = vst [vmem:[#allocation2 + $0x58] sm:$0xff] %v1777_v0 }
  0x55   : > { %253 = vst [vmem:[#allocation2 + $0x40] sm:$0xff] %v1777_v0  ;;  %254 = vst [vmem:[#allocation2 + $0xc8] sm:$0xff] %v1777_v0 }
  0x56   : > { %255 = vst [vmem:[#allocation2 + $0xe0] sm:$0xff] %v1777_v0  ;;  %256 = vst [vmem:[#allocation2 + $0x90] sm:$0xff] %v1777_v0 }
  0x57   : > { %257 = vst [vmem:[#allocation2 + $0x70] sm:$0xff] %v1777_v0  ;;  %258 = vst [vmem:[#allocation2 + $0xc0] sm:$0xff] %v1777_v0 }
  0x58   : > { %259 = vst [vmem:[#allocation2 + $0xa8] sm:$0xff] %v1777_v0  ;;  %260 = vst [vmem:[#allocation2 + $0xd0] sm:$0xff] %v1777_v0 }
  0x59   : > { %261 = vst [vmem:[#allocation2 + $0x10] sm:$0xff] %v1777_v0  ;;  %262 = vst [vmem:[#allocation2 + $0x28] sm:$0xff] %v1777_v0 }
  0x5a   : > { %263 = vst [vmem:[#allocation2 + $0xa0] sm:$0xff] %v1777_v0  ;;  %264 = vst [vmem:[#allocation2 + $0xf8] sm:$0xff] %v1777_v0 }
  0x5b   : > { %265 = vst [vmem:[#allocation2 + $0x20] sm:$0xff] %v1777_v0  ;;  %266 = vst [vmem:[#allocation2 + $0x98] sm:$0xff] %v1777_v0 }
  0x5c PF: > { %v268_v1 = vld [vmem:[%s1941_s25] sm:$0xff]  ;;  %v269_v2 = vld [vmem:[%s1941_s25 + $0x8] sm:$0xff]  ;;  %v270_v5 = vld [vmem:[%s1941_s25 + $0x10] sm:$0xff]  ;;  %s267_s29 = sld [smem:[#allocation3]]  ;;  %p1245_p6 = scmp.ne.s32.totalorder %s1751_s15, 2 }
  0x5d   : > { %v300_v3 = vmax.f32 %v268_v1, 1e-06  ;;  %v301_v4 = vmax.f32 %v269_v2, 1e-06  ;;  %v302_v6 = vmax.f32 %v270_v5, 1e-06 }
  0x5e   : > { %v271_v7 = vld [vmem:[%s1941_s25 + $0x18] sm:$0xff]  ;;  %v272_v9 = vld [vmem:[%s1941_s25 + $0x20] sm:$0xff]  ;;  %v273_v10 = vld [vmem:[%s1941_s25 + $0x28] sm:$0xff]  ;;  %s1247_s15 = sld [smem:[#allocation3 + $0x2]] (!%p1245_p6) }
  0x5f   : > { %1376 = vlog2.f32 %v300_v3  ;;  %v303_v8 = vmax.f32 %v271_v7, 1e-06  ;;  %v304_v11 = vmax.f32 %v272_v9, 1e-06  ;;  %v305_v12 = vmax.f32 %v273_v10, 1e-06 }
  0x60   : > { %1378 = vlog2.f32 %v301_v4  ;;  %v274_v13 = vld [vmem:[%s1941_s25 + $0x30] sm:$0xff]  ;;  %v275_v15 = vld [vmem:[%s1941_s25 + $0x38] sm:$0xff]  ;;  %v276_v17 = vld [vmem:[%s1941_s25 + $0x40] sm:$0xff]  ;;  %s1246_s21 = sld [smem:[#allocation3 + $0x1]] (!%p1245_p6) }
  0x61   : > { %1380 = vlog2.f32 %v302_v6  ;;  %v306_v14 = vmax.f32 %v274_v13, 1e-06  ;;  %v307_v16 = vmax.f32 %v275_v15, 1e-06  ;;  %v277_v18 = vld [vmem:[%s1941_s25 + $0x48] sm:$0xff]  ;;  %v278_v20 = vld [vmem:[%s1941_s25 + $0x50] sm:$0xff] }
  0x62   : > { %1382 = vlog2.f32 %v303_v8  ;;  %v308_v19 = vmax.f32 %v276_v17, 1e-06  ;;  %v309_v21 = vmax.f32 %v277_v18, 1e-06  ;;  %v279_v22 = vld [vmem:[%s1941_s25 + $0x58] sm:$0xff]  ;;  %v280_v24 = vld [vmem:[%s1941_s25 + $0x60] sm:$0xff]  ;;  %v1974_v39 = vstv %s267_s29 }
  0x63   : > { %1384 = vlog2.f32 %v304_v11  ;;  %v310_v23 = vmax.f32 %v278_v20, 1e-06  ;;  %v281_v25 = vld [vmem:[%s1941_s25 + $0x68] sm:$0xff]  ;;  %v311_v26 = vmax.f32 %v279_v22, 1e-06  ;;  %v282_v27 = vld [vmem:[%s1941_s25 + $0x70] sm:$0xff] }
  0x64   : > { %1386 = vlog2.f32 %v305_v12  ;;  %v312_v28 = vmax.f32 %v280_v24, 1e-06  ;;  %v283_v29 = vld [vmem:[%s1941_s25 + $0x78] sm:$0xff]  ;;  %v313_v30 = vmax.f32 %v281_v25, 1e-06  ;;  %v284_v31 = vld [vmem:[%s1941_s25 + $0x80] sm:$0xff] }
  0x65   : > { %1388 = vlog2.f32 %v306_v14  ;;  %v314_v32 = vmax.f32 %v282_v27, 1e-06  ;;  %v285_v33 = vld [vmem:[%s1941_s25 + $0x88] sm:$0xff]  ;;  %v315_v34 = vmax.f32 %v283_v29, 1e-06  ;;  %v286_v35 = vld [vmem:[%s1941_s25 + $0x90] sm:$0xff] }
  0x66   : > { %1390 = vlog2.f32 %v307_v16  ;;  %v316_v36 = vmax.f32 %v284_v31, 1e-06  ;;  %v287_v37 = vld [vmem:[%s1941_s25 + $0x98] sm:$0xff]  ;;  %v317_v40 = vmax.f32 %v285_v33, 1e-06 }
  0x67   : > { %1392 = vlog2.f32 %v308_v19  ;;  %v318_v43 = vmax.f32 %v286_v35, 1e-06  ;;  %v319_v46 = vmax.f32 %v287_v37, 1e-06 }
  0x68   : > { %1394 = vlog2.f32 %v309_v21 }
  0x69   : > { %1396 = vlog2.f32 %v310_v23 }
  0x6a   : > { %1398 = vlog2.f32 %v311_v26 }
  0x6b   : > { %1400 = vlog2.f32 %v312_v28 }
  0x6c   : > { %v1377_v38 = vpop.eup %1376  ;;  %1402 = vlog2.f32 %v313_v30 }
  0x6d   : > { %v1379_v41 = vpop.eup %1378  ;;  %v333_v42 = vmul.f32 0.6931472, %v1377_v38  ;;  %1404 = vlog2.f32 %v314_v32 }
  0x6e   : > { %v1381_v44 = vpop.eup %1380  ;;  %v335_v45 = vmul.f32 0.6931472, %v1379_v41  ;;  %1406 = vlog2.f32 %v315_v34 }
  0x6f   : > { %v1383_v47 = vpop.eup %1382  ;;  %v397_v48 = vmul.f32 %v1974_v39, %v333_v42  ;;  %v337_v49 = vmul.f32 0.6931472, %v1381_v44  ;;  %1408 = vlog2.f32 %v316_v36 }
  0x70   : > { %v1385_v50 = vpop.eup %1384  ;;  %v398_v51 = vmul.f32 %v1974_v39, %v335_v45  ;;  %v339_v52 = vmul.f32 0.6931472, %v1383_v47  ;;  %1410 = vlog2.f32 %v317_v40 }
  0x71   : > { %v1387_v53 = vpop.eup %1386  ;;  %v429_v54 = vmul.f32 1.442695, %v397_v48  ;;  %v399_v55 = vmul.f32 %v1974_v39, %v337_v49  ;;  %v341_v56 = vmul.f32 0.6931472, %v1385_v50  ;;  %1412 = vlog2.f32 %v318_v43  ;;  %v493_v43 = vld [vmem:[#allocation2 + $0xb0] sm:$0xff]  ;;  %v494_v48 = vld [vmem:[#allocation2] sm:$0xff] }
  0x72   : > { %v1389_v57 = vpop.eup %1388  ;;  %v431_v58 = vmul.f32 1.442695, %v398_v51  ;;  %v400_v59 = vmul.f32 %v1974_v39, %v339_v52  ;;  %v343_v60 = vmul.f32 0.6931472, %v1387_v53  ;;  %1414 = vlog2.f32 %v319_v46  ;;  %v495_v53 = vld [vmem:[#allocation2 + $0xd8] sm:$0xff] }
  0x73   : > { %v1391_v61 = vpop.eup %1390  ;;  %1416 = vpow2.f32 %v429_v54  ;;  %v433_v62 = vmul.f32 1.442695, %v399_v55  ;;  %v401_v63 = vmul.f32 %v1974_v39, %v341_v56  ;;  %v345_v0 = vmul.f32 0.6931472, %v1389_v57  ;;  %v288_v57 = vld [vmem:[%s1941_s25 + $0xa0] sm:$0xff] }
  0x74   : > { %v1393_v1 = vpop.eup %1392  ;;  %1418 = vpow2.f32 %v431_v58  ;;  %v435_v2 = vmul.f32 1.442695, %v400_v59  ;;  %v402_v3 = vmul.f32 %v1974_v39, %v343_v60  ;;  %v347_v4 = vmul.f32 0.6931472, %v1391_v61  ;;  %v496_v60 = vld [vmem:[#allocation2 + $0x18] sm:$0xff] }
  0x75   : > { %v1395_v5 = vpop.eup %1394  ;;  %1420 = vpow2.f32 %v433_v62  ;;  %v437_v6 = vmul.f32 1.442695, %v401_v63  ;;  %v403_v7 = vmul.f32 %v1974_v39, %v345_v0  ;;  %v349_v8 = vmul.f32 0.6931472, %v1393_v1  ;;  %v289_v63 = vld [vmem:[%s1941_s25 + $0xa8] sm:$0xff] }
  0x76   : > { %v1397_v9 = vpop.eup %1396  ;;  %1422 = vpow2.f32 %v435_v2  ;;  %v439_v10 = vmul.f32 1.442695, %v402_v3  ;;  %v404_v11 = vmul.f32 %v1974_v39, %v347_v4  ;;  %v351_v12 = vmul.f32 0.6931472, %v1395_v5  ;;  %v497_v2 = vld [vmem:[#allocation2 + $0x50] sm:$0xff] }
  0x77   : > { %v1399_v13 = vpop.eup %1398  ;;  %1424 = vpow2.f32 %v437_v6  ;;  %v441_v14 = vmul.f32 1.442695, %v403_v7  ;;  %v405_v15 = vmul.f32 %v1974_v39, %v349_v8  ;;  %v353_v16 = vmul.f32 0.6931472, %v1397_v9  ;;  %v290_v5 = vld [vmem:[%s1941_s25 + $0xb0] sm:$0xff]  ;;  %v498_v8 = vld [vmem:[#allocation2 + $0x68] sm:$0xff] }
  0x78   : > { %v1401_v17 = vpop.eup %1400  ;;  %1426 = vpow2.f32 %v439_v10  ;;  %v443_v18 = vmul.f32 1.442695, %v404_v11  ;;  %v406_v19 = vmul.f32 %v1974_v39, %v351_v12  ;;  %v355_v20 = vmul.f32 0.6931472, %v1399_v13  ;;  %v291_v11 = vld [vmem:[%s1941_s25 + $0xb8] sm:$0xff] }
  0x79   : > { %v1403_v21 = vpop.eup %1402  ;;  %1428 = vpow2.f32 %v441_v14  ;;  %v445_v22 = vmul.f32 1.442695, %v405_v15  ;;  %v407_v23 = vmul.f32 %v1974_v39, %v353_v16  ;;  %v357_v24 = vmul.f32 0.6931472, %v1401_v17  ;;  %v499_v14 = vld [vmem:[#allocation2 + $0x30] sm:$0xff]  ;;  %v292_v17 = vld [vmem:[%s1941_s25 + $0xc0] sm:$0xff] }
  0x7a   : > { %v1405_v25 = vpop.eup %1404  ;;  %1430 = vpow2.f32 %v443_v18  ;;  %v447_v26 = vmul.f32 1.442695, %v406_v19  ;;  %v408_v27 = vmul.f32 %v1974_v39, %v355_v20  ;;  %v359_v28 = vmul.f32 0.6931472, %v1403_v21  ;;  %v500_v20 = vld [vmem:[#allocation2 + $0x48] sm:$0xff] }
  0x7b   : > { %v1407_v29 = vpop.eup %1406  ;;  %1432 = vpow2.f32 %v445_v22  ;;  %v449_v30 = vmul.f32 1.442695, %v407_v23  ;;  %v409_v31 = vmul.f32 %v1974_v39, %v357_v24  ;;  %v361_v32 = vmul.f32 0.6931472, %v1405_v25  ;;  %v293_v22 = vld [vmem:[%s1941_s25 + $0xc8] sm:$0xff]  ;;  %v501_v25 = vld [vmem:[#allocation2 + $0x80] sm:$0xff] }
  0x7c   : > { %v1409_v33 = vpop.eup %1408  ;;  %1434 = vpow2.f32 %v447_v26  ;;  %v451_v34 = vmul.f32 1.442695, %v408_v27  ;;  %v410_v35 = vmul.f32 %v1974_v39, %v359_v28  ;;  %v363_v36 = vmul.f32 0.6931472, %v1407_v29  ;;  %v294_v27 = vld [vmem:[%s1941_s25 + $0xd0] sm:$0xff] }
  0x7d   : > { %v1411_v37 = vpop.eup %1410  ;;  %1436 = vpow2.f32 %v449_v30  ;;  %v453_v38 = vmul.f32 1.442695, %v409_v31  ;;  %v411_v40 = vmul.f32 %v1974_v39, %v361_v32  ;;  %v365_v41 = vmul.f32 0.6931472, %v1409_v33  ;;  %v502_v30 = vld [vmem:[#allocation2 + $0x88] sm:$0xff]  ;;  %v295_v32 = vld [vmem:[%s1941_s25 + $0xd8] sm:$0xff] }
  0x7e   : > { %v1413_v42 = vpop.eup %1412  ;;  %1438 = vpow2.f32 %v451_v34  ;;  %v455_v44 = vmul.f32 1.442695, %v410_v35  ;;  %v412_v45 = vmul.f32 %v1974_v39, %v363_v36  ;;  %v367_v46 = vmul.f32 0.6931472, %v1411_v37  ;;  %v503_v35 = vld [vmem:[#allocation2 + $0xe8] sm:$0xff]  ;;  %v296_v37 = vld [vmem:[%s1941_s25 + $0xe0] sm:$0xff] }
  0x7f   : > { %v1415_v47 = vpop.eup %1414  ;;  %1440 = vpow2.f32 %v453_v38  ;;  %v457_v49 = vmul.f32 1.442695, %v411_v40  ;;  %v413_v50 = vmul.f32 %v1974_v39, %v365_v41  ;;  %v369_v51 = vmul.f32 0.6931472, %v1413_v42  ;;  %v504_v41 = vld [vmem:[#allocation2 + $0xb8] sm:$0xff] }
  0x80   : > { %v1417_v52 = vpop.eup %1416  ;;  %1442 = vpow2.f32 %v455_v44  ;;  %v459_v54 = vmul.f32 1.442695, %v412_v45  ;;  %v414_v55 = vmul.f32 %v1974_v39, %v367_v46  ;;  %v371_v56 = vmul.f32 0.6931472, %v1415_v47  ;;  %v505_v46 = vld [vmem:[#allocation2 + $0x60] sm:$0xff] }
  0x81   : > { %v1419_v58 = vpop.eup %1418  ;;  %v525_v59 = vadd.f32 %v1417_v52, %v493_v43  ;;  %1444 = vpow2.f32 %v457_v49  ;;  %v461_v61 = vmul.f32 1.442695, %v413_v50  ;;  %v415_v62 = vmul.f32 %v1974_v39, %v369_v51  ;;  %v297_v43 = vld [vmem:[%s1941_s25 + $0xe8] sm:$0xff]  ;;  %v506_v51 = vld [vmem:[#allocation2 + $0xf0] sm:$0xff] }
  0x82   : > { %v1421_v0 = vpop.eup %1420  ;;  %v526_v1 = vadd.f32 %v1419_v58, %v494_v48  ;;  %1446 = vpow2.f32 %v459_v54  ;;  %v463_v3 = vmul.f32 1.442695, %v414_v55  ;;  %v416_v4 = vmul.f32 %v1974_v39, %v371_v56  ;;  %v298_v48 = vld [vmem:[%s1941_s25 + $0xf0] sm:$0xff]  ;;  %v507_v56 = vld [vmem:[#allocation2 + $0x8] sm:$0xff] }
  0x83   : > { %v1423_v6 = vpop.eup %1422  ;;  %557 = vst [vmem:[#allocation2 + $0xb0] sm:$0xff] %v525_v59  ;;  %v527_v7 = vadd.f32 %v1421_v0, %v495_v53  ;;  %1448 = vpow2.f32 %v461_v61  ;;  %v465_v9 = vmul.f32 1.442695, %v415_v62  ;;  %v320_v10 = vmax.f32 %v288_v57, 1e-06  ;;  %v299_v53 = vld [vmem:[%s1941_s25 + $0xf8] sm:$0xff] }
  0x84   : > { %v1425_v12 = vpop.eup %1424  ;;  %558 = vst [vmem:[#allocation2] sm:$0xff] %v526_v1  ;;  %v528_v13 = vadd.f32 %v1423_v6, %v496_v60  ;;  %1450 = vpow2.f32 %v463_v3  ;;  %v467_v15 = vmul.f32 1.442695, %v416_v4  ;;  %v321_v16 = vmax.f32 %v289_v63, 1e-06  ;;  %v508_v60 = vld [vmem:[#allocation2 + $0x78] sm:$0xff] }
  0x85   : > { %v1427_v18 = vpop.eup %1426  ;;  %559 = vst [vmem:[#allocation2 + $0xd8] sm:$0xff] %v527_v7  ;;  %v529_v19 = vadd.f32 %v1425_v12, %v497_v2  ;;  %1452 = vpow2.f32 %v465_v9  ;;  %v322_v21 = vmax.f32 %v290_v5, 1e-06  ;;  %v323_v26 = vmax.f32 %v291_v11, 1e-06  ;;  %v509_v0 = vld [vmem:[#allocation2 + $0x38] sm:$0xff] }
  0x86   : > { %v1429_v23 = vpop.eup %1428  ;;  %560 = vst [vmem:[#allocation2 + $0x18] sm:$0xff] %v528_v13  ;;  %v530_v24 = vadd.f32 %v1427_v18, %v498_v8  ;;  %1454 = vpow2.f32 %v467_v15  ;;  %v324_v31 = vmax.f32 %v292_v17, 1e-06  ;;  %v325_v36 = vmax.f32 %v293_v22, 1e-06  ;;  %v510_v4 = vld [vmem:[#allocation2 + $0x58] sm:$0xff] }
  0x87   : > { %v1431_v28 = vpop.eup %1430  ;;  %561 = vst [vmem:[#allocation2 + $0x50] sm:$0xff] %v529_v19  ;;  %v531_v29 = vadd.f32 %v1429_v23, %v499_v14  ;;  %1456 = vlog2.f32 %v320_v10  ;;  %v326_v42 = vmax.f32 %v294_v27, 1e-06  ;;  %v327_v47 = vmax.f32 %v295_v32, 1e-06  ;;  %v511_v7 = vld [vmem:[#allocation2 + $0x40] sm:$0xff] }
  0x88   : > { %v1433_v33 = vpop.eup %1432  ;;  %562 = vst [vmem:[#allocation2 + $0x68] sm:$0xff] %v530_v24  ;;  %v532_v34 = vadd.f32 %v1431_v28, %v500_v20  ;;  %1458 = vlog2.f32 %v321_v16  ;;  %v328_v52 = vmax.f32 %v296_v37, 1e-06  ;;  %v329_v57 = vmax.f32 %v297_v43, 1e-06  ;;  %v512_v10 = vld [vmem:[#allocation2 + $0xc8] sm:$0xff] }
  0x89   : > { %v1435_v38 = vpop.eup %1434  ;;  %563 = vst [vmem:[#allocation2 + $0x30] sm:$0xff] %v531_v29  ;;  %v533_v40 = vadd.f32 %v1433_v33, %v501_v25  ;;  %1460 = vlog2.f32 %v322_v21  ;;  %v330_v61 = vmax.f32 %v298_v48, 1e-06  ;;  %v331_v1 = vmax.f32 %v299_v53, 1e-06 }
  0x8a   : > { %v1437_v44 = vpop.eup %1436  ;;  %564 = vst [vmem:[#allocation2 + $0x48] sm:$0xff] %v532_v34  ;;  %v534_v45 = vadd.f32 %v1435_v38, %v502_v30  ;;  %1462 = vlog2.f32 %v323_v26 }
  0x8b   : > { %v1439_v49 = vpop.eup %1438  ;;  %565 = vst [vmem:[#allocation2 + $0x80] sm:$0xff] %v533_v40  ;;  %v535_v50 = vadd.f32 %v1437_v44, %v503_v35  ;;  %1464 = vlog2.f32 %v324_v31 }
  0x8c   : > { %v1441_v54 = vpop.eup %1440  ;;  %566 = vst [vmem:[#allocation2 + $0x88] sm:$0xff] %v534_v45  ;;  %v536_v55 = vadd.f32 %v1439_v49, %v504_v41  ;;  %1466 = vlog2.f32 %v325_v36 }
  0x8d   : > { %v1443_v58 = vpop.eup %1442  ;;  %567 = vst [vmem:[#allocation2 + $0xe8] sm:$0xff] %v535_v50  ;;  %v537_v59 = vadd.f32 %v1441_v54, %v505_v46  ;;  %1468 = vlog2.f32 %v326_v42 }
  0x8e   : > { %v1445_v62 = vpop.eup %1444  ;;  %568 = vst [vmem:[#allocation2 + $0xb8] sm:$0xff] %v536_v55  ;;  %v538_v63 = vadd.f32 %v1443_v58, %v506_v51  ;;  %1470 = vlog2.f32 %v327_v47 }
  0x8f   : > { %v1447_v2 = vpop.eup %1446  ;;  %569 = vst [vmem:[#allocation2 + $0x60] sm:$0xff] %v537_v59  ;;  %v539_v3 = vadd.f32 %v1445_v62, %v507_v56  ;;  %1472 = vlog2.f32 %v328_v52 }
  0x90   : > { %v1449_v5 = vpop.eup %1448  ;;  %570 = vst [vmem:[#allocation2 + $0xf0] sm:$0xff] %v538_v63  ;;  %v540_v6 = vadd.f32 %v1447_v2, %v508_v60  ;;  %1474 = vlog2.f32 %v329_v57  ;;  %v514_v2 = vld [vmem:[#allocation2 + $0x90] sm:$0xff] }
  0x91   : > { %v1451_v8 = vpop.eup %1450  ;;  %571 = vst [vmem:[#allocation2 + $0x8] sm:$0xff] %v539_v3  ;;  %v541_v9 = vadd.f32 %v1449_v5, %v509_v0  ;;  %1476 = vlog2.f32 %v330_v61 }
  0x92   : > { %v1453_v11 = vpop.eup %1452  ;;  %572 = vst [vmem:[#allocation2 + $0x78] sm:$0xff] %v540_v6  ;;  %v542_v12 = vadd.f32 %v1451_v8, %v510_v4  ;;  %1478 = vlog2.f32 %v331_v1  ;;  %v513_v1 = vld [vmem:[#allocation2 + $0xe0] sm:$0xff]  ;;  %v515_v4 = vld [vmem:[#allocation2 + $0x70] sm:$0xff] }
  0x93   : > { %v1455_v13 = vpop.eup %1454  ;;  %573 = vst [vmem:[#allocation2 + $0x38] sm:$0xff] %v541_v9  ;;  %v543_v14 = vadd.f32 %v1453_v11, %v511_v7  ;;  %v516_v7 = vld [vmem:[#allocation2 + $0xc0] sm:$0xff] }
  0x94   : > { %v1457_v15 = vpop.eup %1456  ;;  %574 = vst [vmem:[#allocation2 + $0x58] sm:$0xff] %v542_v12  ;;  %v544_v16 = vadd.f32 %v1455_v13, %v512_v10  ;;  %v517_v10 = vld [vmem:[#allocation2 + $0xa8] sm:$0xff] }
  0x95   : > { %v1459_v17 = vpop.eup %1458  ;;  %575 = vst [vmem:[#allocation2 + $0x40] sm:$0xff] %v543_v14  ;;  %v373_v18 = vmul.f32 0.6931472, %v1457_v15  ;;  %v519_v15 = vld [vmem:[#allocation2 + $0x10] sm:$0xff] }
  0x96   : > { %v1461_v19 = vpop.eup %1460  ;;  %576 = vst [vmem:[#allocation2 + $0xc8] sm:$0xff] %v544_v16  ;;  %v375_v20 = vmul.f32 0.6931472, %v1459_v17 }
  0x97   : > { %v1463_v21 = vpop.eup %1462  ;;  %v417_v22 = vmul.f32 %v1974_v39, %v373_v18  ;;  %v377_v23 = vmul.f32 0.6931472, %v1461_v19  ;;  %v520_v18 = vld [vmem:[#allocation2 + $0x28] sm:$0xff] }
  0x98   : > { %v1465_v24 = vpop.eup %1464  ;;  %v418_v25 = vmul.f32 %v1974_v39, %v375_v20  ;;  %v379_v26 = vmul.f32 0.6931472, %v1463_v21  ;;  %v521_v21 = vld [vmem:[#allocation2 + $0xa0] sm:$0xff] }
  0x99   : > { %v1467_v27 = vpop.eup %1466  ;;  %v469_v28 = vmul.f32 1.442695, %v417_v22  ;;  %v419_v29 = vmul.f32 %v1974_v39, %v377_v23  ;;  %v381_v30 = vmul.f32 0.6931472, %v1465_v24  ;;  %v522_v24 = vld [vmem:[#allocation2 + $0xf8] sm:$0xff] }
  0x9a   : > { %v1469_v31 = vpop.eup %1468  ;;  %v471_v32 = vmul.f32 1.442695, %v418_v25  ;;  %v420_v33 = vmul.f32 %v1974_v39, %v379_v26  ;;  %v383_v34 = vmul.f32 0.6931472, %v1467_v27  ;;  %v523_v27 = vld [vmem:[#allocation2 + $0x20] sm:$0xff] }
  0x9b   : > { %v1471_v35 = vpop.eup %1470  ;;  %1480 = vpow2.f32 %v469_v28  ;;  %v473_v36 = vmul.f32 1.442695, %v419_v29  ;;  %v421_v37 = vmul.f32 %v1974_v39, %v381_v30  ;;  %v385_v38 = vmul.f32 0.6931472, %v1469_v31  ;;  %v524_v30 = vld [vmem:[#allocation2 + $0x98] sm:$0xff] }
  0x9c   : > { %v1473_v40 = vpop.eup %1472  ;;  %1482 = vpow2.f32 %v471_v32  ;;  %v475_v41 = vmul.f32 1.442695, %v420_v33  ;;  %v422_v42 = vmul.f32 %v1974_v39, %v383_v34  ;;  %v387_v43 = vmul.f32 0.6931472, %v1471_v35 }
  0x9d   : > { %v1475_v44 = vpop.eup %1474  ;;  %1484 = vpow2.f32 %v473_v36  ;;  %v477_v45 = vmul.f32 1.442695, %v421_v37  ;;  %v423_v46 = vmul.f32 %v1974_v39, %v385_v38  ;;  %v389_v47 = vmul.f32 0.6931472, %v1473_v40 }
  0x9e   : > { %v1477_v48 = vpop.eup %1476  ;;  %1486 = vpow2.f32 %v475_v41  ;;  %v479_v49 = vmul.f32 1.442695, %v422_v42  ;;  %v424_v50 = vmul.f32 %v1974_v39, %v387_v43  ;;  %v391_v51 = vmul.f32 0.6931472, %v1475_v44 }
  0x9f   : > { %v1479_v52 = vpop.eup %1478  ;;  %1488 = vpow2.f32 %v477_v45  ;;  %v481_v53 = vmul.f32 1.442695, %v423_v46  ;;  %v425_v54 = vmul.f32 %v1974_v39, %v389_v47  ;;  %v393_v55 = vmul.f32 0.6931472, %v1477_v48 }
  0xa0   : > { %1490 = vpow2.f32 %v479_v49  ;;  %v483_v56 = vmul.f32 1.442695, %v424_v50  ;;  %v426_v57 = vmul.f32 %v1974_v39, %v391_v51  ;;  %v395_v58 = vmul.f32 0.6931472, %v1479_v52 }
  0xa1   : > { %1492 = vpow2.f32 %v481_v53  ;;  %v485_v59 = vmul.f32 1.442695, %v425_v54  ;;  %v427_v60 = vmul.f32 %v1974_v39, %v393_v55 }
  0xa2   : > { %1494 = vpow2.f32 %v483_v56  ;;  %v487_v61 = vmul.f32 1.442695, %v426_v57  ;;  %v428_v62 = vmul.f32 %v1974_v39, %v395_v58  ;;  %v518_v39 = vld [vmem:[#allocation2 + $0xd0] sm:$0xff] }
  0xa3   : > { %1496 = vpow2.f32 %v485_v59  ;;  %v489_v63 = vmul.f32 1.442695, %v427_v60 }
  0xa4   : > { %1498 = vpow2.f32 %v487_v61  ;;  %v491_v0 = vmul.f32 1.442695, %v428_v62 }
  0xa5   : > { %1500 = vpow2.f32 %v489_v63 }
  0xa6   : > { %1502 = vpow2.f32 %v491_v0 }
  0xa8   : > { %v1481_v3 = vpop.eup %1480 }
  0xa9   : > { %v1483_v5 = vpop.eup %1482  ;;  %v545_v6 = vadd.f32 %v1481_v3, %v513_v1 }
  0xaa   : > { %v1485_v8 = vpop.eup %1484  ;;  %v546_v9 = vadd.f32 %v1483_v5, %v514_v2 }
  0xab   : > { %v1487_v11 = vpop.eup %1486  ;;  %577 = vst [vmem:[#allocation2 + $0xe0] sm:$0xff] %v545_v6  ;;  %v547_v12 = vadd.f32 %v1485_v8, %v515_v4 }
  0xac   : > { %v1489_v13 = vpop.eup %1488  ;;  %578 = vst [vmem:[#allocation2 + $0x90] sm:$0xff] %v546_v9  ;;  %v548_v14 = vadd.f32 %v1487_v11, %v516_v7 }
  0xad   : > { %v1491_v16 = vpop.eup %1490  ;;  %579 = vst [vmem:[#allocation2 + $0x70] sm:$0xff] %v547_v12  ;;  %v549_v17 = vadd.f32 %v1489_v13, %v517_v10 }
  0xae   : > { %v1493_v19 = vpop.eup %1492  ;;  %580 = vst [vmem:[#allocation2 + $0xc0] sm:$0xff] %v548_v14  ;;  %v550_v20 = vadd.f32 %v1491_v16, %v518_v39 }
  0xaf   : > { %v1495_v22 = vpop.eup %1494  ;;  %581 = vst [vmem:[#allocation2 + $0xa8] sm:$0xff] %v549_v17  ;;  %v551_v23 = vadd.f32 %v1493_v19, %v519_v15 }
  0xb0   : > { %v1497_v25 = vpop.eup %1496  ;;  %582 = vst [vmem:[#allocation2 + $0xd0] sm:$0xff] %v550_v20  ;;  %v552_v26 = vadd.f32 %v1495_v22, %v520_v18 }
  0xb1   : > { %v1499_v28 = vpop.eup %1498  ;;  %583 = vst [vmem:[#allocation2 + $0x10] sm:$0xff] %v551_v23  ;;  %v553_v29 = vadd.f32 %v1497_v25, %v521_v21 }
  0xb2   : > { %v1501_v31 = vpop.eup %1500  ;;  %584 = vst [vmem:[#allocation2 + $0x28] sm:$0xff] %v552_v26  ;;  %v554_v32 = vadd.f32 %v1499_v28, %v522_v24  ;;  %592 = sbr.rel (%p1245_p6) target bundleno = 425 (0x1a9), region = 44 }
  0xb3   : > { %v1503_v33 = vpop.eup %1502  ;;  %585 = vst [vmem:[#allocation2 + $0xa0] sm:$0xff] %v553_v29  ;;  %v555_v34 = vadd.f32 %v1501_v31, %v523_v27 }
  0xb4   : > { %586 = vst [vmem:[#allocation2 + $0xf8] sm:$0xff] %v554_v32  ;;  %v556_v35 = vadd.f32 %v1503_v33, %v524_v30 }
  0xb5   : > { %587 = vst [vmem:[#allocation2 + $0x20] sm:$0xff] %v555_v34 }
  0xb6   : > { %588 = vst [vmem:[#allocation2 + $0x98] sm:$0xff] %v556_v35 }
  0xb7   : > { %v611_v36 = vld [vmem:[#allocation2 + $0x38] sm:$0xff]  ;;  %v595_v37 = vld [vmem:[#allocation2 + $0xb0] sm:$0xff]  ;;  %v596_v40 = vld [vmem:[#allocation2] sm:$0xff]  ;;  %v2021_v5 = vstv %s1247_s15  ;;  %v2031_v22 = vstv %s1246_s21  ;;  %vm928_vm0 = vcmask 130112   ;;  %vm935_vm1 = vcmask 195712  }
  0xb8   : > { %659 = vadd.xlane.f32.xlu1 %v611_v36  ;;  %627 = vadd.xlane.f32.xlu0 %v595_v37  ;;  %v612_v38 = vld [vmem:[#allocation2 + $0x58] sm:$0xff]  ;;  %v613_v41 = vld [vmem:[#allocation2 + $0x40] sm:$0xff]  ;;  %v614_v43 = vld [vmem:[#allocation2 + $0xc8] sm:$0xff]  ;;  %vm942_vm2 = vcmask 261312   ;;  %vm949_vm3 = vcmask 326912   ;;  %vm956_vm4 = vcmask 392512  }
  0xb9   : > { %v597_v42 = vld [vmem:[#allocation2 + $0xd8] sm:$0xff]  ;;  %v615_v45 = vld [vmem:[#allocation2 + $0xe0] sm:$0xff]  ;;  %v599_v46 = vld [vmem:[#allocation2 + $0x50] sm:$0xff]  ;;  %vm963_vm5 = vcmask 458112   ;;  %vm970_vm6 = vcmask 523712   ;;  %vm977_vm7 = vcmask 589312  }
  0xba   : > { %v598_v44 = vld [vmem:[#allocation2 + $0x18] sm:$0xff]  ;;  %v616_v47 = vld [vmem:[#allocation2 + $0x90] sm:$0xff]  ;;  %v600_v48 = vld [vmem:[#allocation2 + $0x68] sm:$0xff]  ;;  %vm984_vm8 = vcmask 654912   ;;  %vm991_vm9 = vcmask 720512   ;;  %vm998_vm10 = vcmask 786112  }
  0xbb   : > { %v617_v49 = vld [vmem:[#allocation2 + $0x70] sm:$0xff]  ;;  %v618_v51 = vld [vmem:[#allocation2 + $0xc0] sm:$0xff]  ;;  %v602_v52 = vld [vmem:[#allocation2 + $0x48] sm:$0xff]  ;;  %vm1005_vm11 = vcmask 851712   ;;  %vm1012_vm12 = vcmask 917312   ;;  %vm1019_vm13 = vcmask 982912  }
  0xbc   : > { %661 = vadd.xlane.f32.xlu1 %v612_v38  ;;  %629 = vadd.xlane.f32.xlu0 %v596_v40  ;;  %v601_v50 = vld [vmem:[#allocation2 + $0x30] sm:$0xff]  ;;  %v619_v53 = vld [vmem:[#allocation2 + $0xa8] sm:$0xff]  ;;  %v603_v54 = vld [vmem:[#allocation2 + $0x80] sm:$0xff]  ;;  %vm1026_vm14 = vcmask 1048512   ;;  %vm1107_vm15 = vcmask 1041409  }
  0xbd   : > { %v620_v55 = vld [vmem:[#allocation2 + $0xd0] sm:$0xff]  ;;  %v604_v56 = vld [vmem:[#allocation2 + $0x88] sm:$0xff]  ;;  %v606_v60 = vld [vmem:[#allocation2 + $0xb8] sm:$0xff] }
  0xbe   : > { %v621_v57 = vld [vmem:[#allocation2 + $0x10] sm:$0xff]  ;;  %v605_v58 = vld [vmem:[#allocation2 + $0xe8] sm:$0xff]  ;;  %v623_v61 = vld [vmem:[#allocation2 + $0xa0] sm:$0xff] }
  0xbf   : > { %v622_v59 = vld [vmem:[#allocation2 + $0x28] sm:$0xff]  ;;  %v607_v62 = vld [vmem:[#allocation2 + $0x60] sm:$0xff]  ;;  %v624_v63 = vld [vmem:[#allocation2 + $0xf8] sm:$0xff] }
  0xc0   : > { %663 = vadd.xlane.f32.xlu1 %v613_v41  ;;  %631 = vadd.xlane.f32.xlu0 %v597_v42  ;;  %v608_v0 = vld [vmem:[#allocation2 + $0xf0] sm:$0xff]  ;;  %v625_v1 = vld [vmem:[#allocation2 + $0x20] sm:$0xff]  ;;  %v609_v2 = vld [vmem:[#allocation2 + $0x8] sm:$0xff] }
  0xc1   : > { %v626_v3 = vld [vmem:[#allocation2 + $0x98] sm:$0xff] }
  0xc2   : > { %v610_v4 = vld [vmem:[#allocation2 + $0x78] sm:$0xff] }
  0xc4   : > { %665 = vadd.xlane.f32.xlu1 %v614_v43  ;;  %633 = vadd.xlane.f32.xlu0 %v598_v44 }
  0xc8   : > { %667 = vadd.xlane.f32.xlu1 %v615_v45  ;;  %635 = vadd.xlane.f32.xlu0 %v599_v46 }
  0xcc   : > { %669 = vadd.xlane.f32.xlu1 %v616_v47  ;;  %637 = vadd.xlane.f32.xlu0 %v600_v48 }
  0xd0   : > { %671 = vadd.xlane.f32.xlu1 %v617_v49  ;;  %639 = vadd.xlane.f32.xlu0 %v601_v50 }
  0xd4   : > { %673 = vadd.xlane.f32.xlu1 %v618_v51  ;;  %641 = vadd.xlane.f32.xlu0 %v602_v52 }
  0xd8   : > { %675 = vadd.xlane.f32.xlu1 %v619_v53  ;;  %643 = vadd.xlane.f32.xlu0 %v603_v54 }
  0xdc   : > { %677 = vadd.xlane.f32.xlu1 %v620_v55  ;;  %645 = vadd.xlane.f32.xlu0 %v604_v56 }
  0xe0   : > { %679 = vadd.xlane.f32.xlu1 %v621_v57  ;;  %647 = vadd.xlane.f32.xlu0 %v605_v58 }
  0xe4   : > { %681 = vadd.xlane.f32.xlu1 %v622_v59  ;;  %649 = vadd.xlane.f32.xlu0 %v606_v60 }
  0xe8   : > { %683 = vadd.xlane.f32.xlu1 %v623_v61  ;;  %651 = vadd.xlane.f32.xlu0 %v607_v62 }
  0xec   : > { %685 = vadd.xlane.f32.xlu1 %v624_v63  ;;  %653 = vadd.xlane.f32.xlu0 %v608_v0 }
  0xf0   : > { %687 = vadd.xlane.f32.xlu1 %v625_v1  ;;  %655 = vadd.xlane.f32.xlu0 %v609_v2 }
  0xf4   : > { %689 = vadd.xlane.f32.xlu1 %v626_v3  ;;  %657 = vadd.xlane.f32.xlu0 %v610_v4 }
 0x141   : > { %v660_v6 = vpop.xlane.xlu1 %659  ;;  %v628_v7 = vpop.xlane.xlu0 %627 }
 0x142   : > { %v708_v8 = vmul.f32 %v2021_v5, %v660_v6  ;;  %v692_v9 = vmul.f32 %v2021_v5, %v628_v7 }
 0x144   : > { %1504 = vlog2.f32 %v708_v8 }
 0x145   : > { %1506 = vlog2.f32 %v692_v9  ;;  %v662_v10 = vpop.xlane.xlu1 %661  ;;  %v630_v11 = vpop.xlane.xlu0 %629 }
 0x146   : > { %v709_v12 = vmul.f32 %v2021_v5, %v662_v10  ;;  %v693_v39 = vmul.f32 %v2021_v5, %v630_v11 }
 0x148   : > { %1508 = vlog2.f32 %v709_v12 }
 0x149   : > { %1510 = vlog2.f32 %v693_v39  ;;  %v664_v13 = vpop.xlane.xlu1 %663  ;;  %v632_v14 = vpop.xlane.xlu0 %631 }
 0x14a   : > { %v710_v15 = vmul.f32 %v2021_v5, %v664_v13  ;;  %v694_v16 = vmul.f32 %v2021_v5, %v632_v14 }
 0x14c   : > { %1512 = vlog2.f32 %v710_v15 }
 0x14d   : > { %1514 = vlog2.f32 %v694_v16  ;;  %v666_v17 = vpop.xlane.xlu1 %665  ;;  %v634_v18 = vpop.xlane.xlu0 %633 }
 0x14e   : > { %v711_v19 = vmul.f32 %v2021_v5, %v666_v17  ;;  %v695_v20 = vmul.f32 %v2021_v5, %v634_v18 }
 0x150   : > { %1516 = vlog2.f32 %v711_v19 }
 0x151   : > { %v1505_v21 = vpop.eup %1504  ;;  %v668_v23 = vpop.xlane.xlu1 %667  ;;  %1518 = vlog2.f32 %v695_v20 }
 0x152   : > { %v636_v24 = vpop.xlane.xlu0 %635  ;;  %v1507_v25 = vpop.eup %1506  ;;  %v757_v26 = vmul.f32 0.6931472, %v1505_v21  ;;  %v712_v35 = vmul.f32 %v2021_v5, %v668_v23 }
 0x153   : > { %v725_v27 = vmul.f32 0.6931472, %v1507_v25  ;;  %v696_v37 = vmul.f32 %v2021_v5, %v636_v24 }
 0x154   : > { %v805_v28 = vmul.f32 %v2031_v22, %v757_v26  ;;  %1520 = vlog2.f32 %v712_v35 }
 0x155   : > { %v1509_v29 = vpop.eup %1508  ;;  %v789_v30 = vmul.f32 %v2031_v22, %v725_v27  ;;  %v670_v31 = vpop.xlane.xlu1 %669  ;;  %1522 = vlog2.f32 %v696_v37 }
 0x156   : > { %v638_v32 = vpop.xlane.xlu0 %637  ;;  %v1511_v33 = vpop.eup %1510  ;;  %v759_v34 = vmul.f32 0.6931472, %v1509_v29  ;;  %v853_v38 = vmul.f32 1.442695, %v805_v28  ;;  %v713_v48 = vmul.f32 %v2021_v5, %v670_v31 }
 0x157   : > { %v727_v36 = vmul.f32 0.6931472, %v1511_v33  ;;  %v821_v42 = vmul.f32 1.442695, %v789_v30  ;;  %v697_v50 = vmul.f32 %v2021_v5, %v638_v32 }
 0x158   : > { %v806_v40 = vmul.f32 %v2031_v22, %v759_v34  ;;  %1524 = vpow2.f32 %v853_v38 }
 0x159   : > { %v1513_v41 = vpop.eup %1512  ;;  %v790_v43 = vmul.f32 %v2031_v22, %v727_v36  ;;  %v672_v44 = vpop.xlane.xlu1 %671  ;;  %1526 = vpow2.f32 %v821_v42  ;;  %v917_v42 = vlaneseq }
 0x15a   : > { %v640_v45 = vpop.xlane.xlu0 %639  ;;  %v1515_v46 = vpop.eup %1514  ;;  %v761_v47 = vmul.f32 0.6931472, %v1513_v41  ;;  %v855_v51 = vmul.f32 1.442695, %v806_v40  ;;  %1528 = vlog2.f32 %v713_v48  ;;  %v714_v59 = vmul.f32 %v2021_v5, %v672_v44 }
 0x15b   : > { %v729_v49 = vmul.f32 0.6931472, %v1515_v46  ;;  %v823_v54 = vmul.f32 1.442695, %v790_v43  ;;  %1530 = vlog2.f32 %v697_v50  ;;  %v698_v60 = vmul.f32 %v2021_v5, %v640_v45 }
 0x15c   : > { %v807_v52 = vmul.f32 %v2031_v22, %v761_v47  ;;  %1532 = vpow2.f32 %v855_v51 }
 0x15d   : > { %v1517_v53 = vpop.eup %1516  ;;  %v674_v55 = vpop.xlane.xlu1 %673  ;;  %v791_v57 = vmul.f32 %v2031_v22, %v729_v49  ;;  %1534 = vpow2.f32 %v823_v54 }
 0x15e   : > { %v642_v56 = vpop.xlane.xlu0 %641  ;;  %v763_v58 = vmul.f32 0.6931472, %v1517_v53  ;;  %v1519_v61 = vpop.eup %1518  ;;  %v857_v62 = vmul.f32 1.442695, %v807_v52  ;;  %v715_v0 = vmul.f32 %v2021_v5, %v674_v55  ;;  %1536 = vlog2.f32 %v714_v59 }
 0x15f   : > { %v825_v3 = vmul.f32 1.442695, %v791_v57  ;;  %v731_v4 = vmul.f32 0.6931472, %v1519_v61  ;;  %1538 = vlog2.f32 %v698_v60  ;;  %v699_v6 = vmul.f32 %v2021_v5, %v642_v56 }
 0x160   : > { %v808_v63 = vmul.f32 %v2031_v22, %v763_v58  ;;  %1540 = vpow2.f32 %v857_v62  ;;  %v2077_v57 = vand.u32 127, %v917_v42 }
 0x161   : > { %v676_v1 = vpop.xlane.xlu1 %675  ;;  %1542 = vlog2.f32 %v715_v0  ;;  %v1521_v12 = vpop.eup %1520  ;;  %v792_v39 = vmul.f32 %v2031_v22, %v731_v4 }
 0x162   : > { %v644_v2 = vpop.xlane.xlu0 %643  ;;  %v859_v7 = vmul.f32 1.442695, %v808_v63  ;;  %v716_v8 = vmul.f32 %v2021_v5, %v676_v1  ;;  %1544 = vpow2.f32 %v825_v3  ;;  %v1523_v14 = vpop.eup %1522  ;;  %v765_v20 = vmul.f32 0.6931472, %v1521_v12 }
 0x163   : > { %v700_v11 = vmul.f32 %v2021_v5, %v644_v2  ;;  %1546 = vlog2.f32 %v699_v6  ;;  %v827_v24 = vmul.f32 1.442695, %v792_v39  ;;  %v733_v25 = vmul.f32 0.6931472, %v1523_v14 }
 0x164   : > { %1548 = vpow2.f32 %v859_v7  ;;  %v809_v32 = vmul.f32 %v2031_v22, %v765_v20  ;;  %v2083_v7 = vshrl.u32 %v917_v42, 7 }
 0x165   : > { %v678_v9 = vpop.xlane.xlu1 %677  ;;  %v2053_v16 = vpop.eup %1524  ;;  %1550 = vlog2.f32 %v716_v8  ;;  %v793_v36 = vmul.f32 %v2031_v22, %v733_v25 }
 0x166   : > { %v646_v10 = vpop.xlane.xlu0 %645  ;;  %v717_v13 = vmul.f32 %v2021_v5, %v678_v9  ;;  %v2055_v19 = vpop.eup %1526  ;;  %1552 = vlog2.f32 %v700_v11  ;;  %v861_v46 = vmul.f32 1.442695, %v809_v32 }
 0x167   : > { %v701_v15 = vmul.f32 %v2021_v5, %v646_v10  ;;  %v1529_v23 = vpop.eup %1528  ;;  %v829_v51 = vmul.f32 1.442695, %v793_v36  ;;  %v923_v10 = vadd.s32 4294967288, %v2077_v57 }
 0x168   : > { %1554 = vlog2.f32 %v717_v13  ;;  %v1531_v27 = vpop.eup %1530  ;;  %v767_v33 = vmul.f32 0.6931472, %v1529_v23 }
 0x169   : > { %v680_v17 = vpop.xlane.xlu1 %679  ;;  %1556 = vlog2.f32 %v701_v15  ;;  %v2059_v28 = vpop.eup %1532  ;;  %v735_v37 = vmul.f32 0.6931472, %v1531_v27 }
 0x16a   : > { %v648_v18 = vpop.xlane.xlu0 %647  ;;  %v718_v21 = vmul.f32 %v2021_v5, %v680_v17  ;;  %v2061_v31 = vpop.eup %1534  ;;  %v810_v47 = vmul.f32 %v2031_v22, %v767_v33 }
 0x16b   : > { %v702_v26 = vmul.f32 %v2021_v5, %v648_v18  ;;  %v1537_v35 = vpop.eup %1536  ;;  %v794_v52 = vmul.f32 %v2031_v22, %v735_v37  ;;  %v2098_v37 = vsub.s32 %v923_v10, %v2083_v7 }
 0x16c   : > { %1558 = vlog2.f32 %v718_v21  ;;  %v1539_v40 = vpop.eup %1538  ;;  %v769_v48 = vmul.f32 0.6931472, %v1537_v35  ;;  %v863_v62 = vmul.f32 1.442695, %v810_v47 }
 0x16d   : > { %v682_v29 = vpop.xlane.xlu1 %681  ;;  %1560 = vlog2.f32 %v702_v26  ;;  %v2067_v41 = vpop.eup %1540  ;;  %v737_v53 = vmul.f32 0.6931472, %v1539_v40  ;;  %v831_v2 = vmul.f32 1.442695, %v794_v52  ;;  %v2093_v26 = vsub.s32 %v2077_v57, %v2083_v7 }
 0x16e   : > { %v650_v30 = vpop.xlane.xlu0 %649  ;;  %v719_v34 = vmul.f32 %v2021_v5, %v682_v29  ;;  %1562 = vpow2.f32 %v827_v24  ;;  %v1543_v45 = vpop.eup %1542  ;;  %v811_v63 = vmul.f32 %v2031_v22, %v769_v48 }
 0x16f   : > { %v703_v38 = vmul.f32 %v2021_v5, %v650_v30  ;;  %v2071_v50 = vpop.eup %1544  ;;  %v771_v58 = vmul.f32 0.6931472, %v1543_v45  ;;  %v795_v3 = vmul.f32 %v2031_v22, %v737_v53 }
 0x170   : > { %1564 = vlog2.f32 %v719_v34  ;;  %v1547_v55 = vpop.eup %1546  ;;  %v865_v15 = vmul.f32 1.442695, %v811_v63 }
 0x171   : > { %1566 = vlog2.f32 %v703_v38  ;;  %v684_v43 = vpop.xlane.xlu1 %683  ;;  %v2075_v56 = vpop.eup %1548  ;;  %v739_v8 = vmul.f32 0.6931472, %v1547_v55  ;;  %v812_v11 = vmul.f32 %v2031_v22, %v771_v58  ;;  %v833_v21 = vmul.f32 1.442695, %v795_v3 }
 0x172   : > { %v652_v44 = vpop.xlane.xlu0 %651  ;;  %v720_v49 = vmul.f32 %v2021_v5, %v684_v43  ;;  %v1551_v61 = vpop.eup %1550  ;;  %v930_v43 = vadd.s32 4294967280, %v2077_v57 }
 0x173   : > { %v704_v54 = vmul.f32 %v2021_v5, %v652_v44  ;;  %v1553_v1 = vpop.eup %1552  ;;  %v773_v12 = vmul.f32 0.6931472, %v1551_v61  ;;  %v796_v27 = vmul.f32 %v2031_v22, %v739_v8  ;;  %v867_v32 = vmul.f32 1.442695, %v812_v11 }
 0x174   : > { %1568 = vlog2.f32 %v720_v49  ;;  %v741_v17 = vmul.f32 0.6931472, %v1553_v1 }
 0x175   : > { %1570 = vlog2.f32 %v704_v54  ;;  %v686_v59 = vpop.xlane.xlu1 %685  ;;  %v1555_v6 = vpop.eup %1554  ;;  %v813_v33 = vmul.f32 %v2031_v22, %v773_v12 }
 0x176   : > { %v654_v60 = vpop.xlane.xlu0 %653  ;;  %1572 = vpow2.f32 %v861_v46  ;;  %v721_v0 = vmul.f32 %v2021_v5, %v686_v59  ;;  %v1557_v9 = vpop.eup %1556  ;;  %v775_v23 = vmul.f32 0.6931472, %v1555_v6  ;;  %v797_v38 = vmul.f32 %v2031_v22, %v741_v17 }
 0x177   : > { %1574 = vpow2.f32 %v829_v51  ;;  %v705_v4 = vmul.f32 %v2021_v5, %v654_v60  ;;  %v743_v29 = vmul.f32 0.6931472, %v1557_v9  ;;  %v835_v46 = vmul.f32 1.442695, %v796_v27 }
 0x178   : > { %1576 = vlog2.f32 %v721_v0  ;;  %v814_v44 = vmul.f32 %v2031_v22, %v775_v23  ;;  %v869_v52 = vmul.f32 1.442695, %v813_v33  ;;  %v837_v58 = vmul.f32 1.442695, %v797_v38 }
 0x179   : > { %1578 = vlog2.f32 %v705_v4  ;;  %v688_v39 = vpop.xlane.xlu1 %687  ;;  %v1559_v14 = vpop.eup %1558  ;;  %v798_v47 = vmul.f32 %v2031_v22, %v743_v29  ;;  %v944_v6 = vadd.s32 4294967264, %v2077_v57 }
 0x17a   : > { %v656_v13 = vpop.xlane.xlu0 %655  ;;  %1580 = vpow2.f32 %v863_v62  ;;  %v722_v18 = vmul.f32 %v2021_v5, %v688_v39  ;;  %v1561_v20 = vpop.eup %1560  ;;  %v777_v34 = vmul.f32 0.6931472, %v1559_v14  ;;  %v871_v62 = vmul.f32 1.442695, %v814_v44 }
 0x17b   : > { %1582 = vpow2.f32 %v831_v2  ;;  %v706_v24 = vmul.f32 %v2021_v5, %v656_v13  ;;  %v2089_v25 = vpop.eup %1562  ;;  %v745_v40 = vmul.f32 0.6931472, %v1561_v20  ;;  %v937_v2 = vadd.s32 4294967272, %v2077_v57 }
 0x17c   : > { %1584 = vlog2.f32 %v722_v18  ;;  %v815_v53 = vmul.f32 %v2031_v22, %v777_v34  ;;  %v839_v3 = vmul.f32 1.442695, %v798_v47  ;;  %v951_v14 = vadd.s32 4294967256, %v2077_v57 }
 0x17d   : > { %v1565_v30 = vpop.eup %1564  ;;  %1586 = vlog2.f32 %v706_v24  ;;  %v690_v35 = vpop.xlane.xlu1 %689  ;;  %v799_v59 = vmul.f32 %v2031_v22, %v745_v40  ;;  %v2124_v20 = vsub.s32 %v930_v43, %v2083_v7  ;;  %v2128_v27 = vsub.s32 %v937_v2, %v2083_v7 }
 0x17e   : > { %v1567_v36 = vpop.eup %1566  ;;  %1588 = vpow2.f32 %v865_v15  ;;  %v658_v42 = vpop.xlane.xlu0 %657  ;;  %v779_v45 = vmul.f32 0.6931472, %v1565_v30  ;;  %v723_v49 = vmul.f32 %v2021_v5, %v690_v35  ;;  %v873_v8 = vmul.f32 1.442695, %v815_v53 }
 0x17f   : > { %1590 = vpow2.f32 %v833_v21  ;;  %v747_v48 = vmul.f32 0.6931472, %v1567_v36  ;;  %v707_v54 = vmul.f32 %v2021_v5, %v658_v42  ;;  %v841_v11 = vmul.f32 1.442695, %v799_v59 }
 0x180   : > { %1592 = vpow2.f32 %v867_v32  ;;  %v816_v63 = vmul.f32 %v2031_v22, %v779_v45  ;;  %v2132_v33 = vsub.s32 %v944_v6, %v2083_v7  ;;  %v2137_v38 = vsub.s32 %v951_v14, %v2083_v7 }
 0x181   : > { %v1569_v51 = vpop.eup %1568  ;;  %1594 = vlog2.f32 %v723_v49  ;;  %v800_v5 = vmul.f32 %v2031_v22, %v747_v48  ;;  %v958_v44 = vadd.s32 4294967248, %v2077_v57  ;;  %v965_v47 = vadd.s32 4294967240, %v2077_v57 }
 0x182   : > { %v1571_v55 = vpop.eup %1570  ;;  %v781_v60 = vmul.f32 0.6931472, %v1569_v51  ;;  %1596 = vlog2.f32 %v707_v54  ;;  %v875_v15 = vmul.f32 1.442695, %v816_v63  ;;  %v972_v48 = vadd.s32 4294967232, %v2077_v57 }
 0x183   : > { %v2108_v61 = vpop.eup %1572  ;;  %v749_v0 = vmul.f32 0.6931472, %v1571_v55  ;;  %1598 = vpow2.f32 %v835_v46  ;;  %v843_v21 = vmul.f32 1.442695, %v800_v5  ;;  %v986_v53 = vadd.s32 4294967216, %v2077_v57 }
 0x184   : > { %v2111_v1 = vpop.eup %1574  ;;  %1600 = vpow2.f32 %v869_v52  ;;  %v817_v9 = vmul.f32 %v2031_v22, %v781_v60  ;;  %v979_v52 = vadd.s32 4294967224, %v2077_v57  ;;  %v1000_v59 = vadd.s32 4294967200, %v2077_v57 }
 0x185   : > { %v1577_v4 = vpop.eup %1576  ;;  %1602 = vpow2.f32 %v837_v58  ;;  %v801_v12 = vmul.f32 %v2031_v22, %v749_v0  ;;  %v993_v58 = vadd.s32 4294967208, %v2077_v57  ;;  %v2153_v63 = vsub.s32 %v958_v44, %v2083_v7 }
 0x186   : > { %v1579_v10 = vpop.eup %1578  ;;  %v783_v39 = vmul.f32 0.6931472, %v1577_v4  ;;  %1604 = vpow2.f32 %v871_v62  ;;  %v877_v29 = vmul.f32 1.442695, %v817_v9  ;;  %v1007_v0 = vadd.s32 4294967192, %v2077_v57 }
 0x187   : > { %v2118_v13 = vpop.eup %1580  ;;  %v751_v17 = vmul.f32 0.6931472, %v1579_v10  ;;  %1606 = vpow2.f32 %v839_v3  ;;  %v845_v34 = vmul.f32 1.442695, %v801_v12  ;;  %v2159_v5 = vsub.s32 %v965_v47, %v2083_v7 }
 0x188   : > { %v2121_v18 = vpop.eup %1582  ;;  %v818_v23 = vmul.f32 %v2031_v22, %v783_v39  ;;  %1608 = vpow2.f32 %v873_v8  ;;  %v1014_v4 = vadd.s32 4294967184, %v2077_v57  ;;  %v2165_v9 = vsub.s32 %v972_v48, %v2083_v7 }
 0x189   : > { %v1585_v24 = vpop.eup %1584  ;;  %v802_v30 = vmul.f32 %v2031_v22, %v751_v17  ;;  %1610 = vpow2.f32 %v841_v11  ;;  %v2168_v10 = vsub.s32 %v979_v52, %v2083_v7  ;;  %v2174_v39 = vsub.s32 %v986_v53, %v2083_v7 }
 0x18a   : > { %v1587_v32 = vpop.eup %1586  ;;  %v785_v35 = vmul.f32 0.6931472, %v1585_v24  ;;  %1612 = vpow2.f32 %v875_v15  ;;  %v879_v40 = vmul.f32 1.442695, %v818_v23  ;;  %v2177_v14 = vsub.s32 %v993_v58, %v2083_v7 }
 0x18b   : > { %v2134_v36 = vpop.eup %1588  ;;  %v753_v42 = vmul.f32 0.6931472, %v1587_v32  ;;  %1614 = vpow2.f32 %v843_v21  ;;  %v847_v45 = vmul.f32 1.442695, %v802_v30  ;;  %v2180_v15 = vsub.s32 %v1000_v59, %v2083_v7 }
 0x18c   : > { %v2139_v43 = vpop.eup %1590  ;;  %v819_v46 = vmul.f32 %v2031_v22, %v785_v35  ;;  %1616 = vpow2.f32 %v877_v29  ;;  %v1035_v23 = vrot.slane %v2059_v28, %v2098_v37  ;;  %v2188_v24 = vsub.s32 %v1007_v0, %v2083_v7 }
 0x18d   : > { %v803_v49 = vmul.f32 %v2031_v22, %v753_v42  ;;  %v2146_v51 = vpop.eup %1592  ;;  %1618 = vpow2.f32 %v845_v34  ;;  %v1021_v29 = vadd.s32 4294967176, %v2077_v57  ;;  %v927_v34 = vrot.slane %v2061_v31, %v2098_v37 }
 0x18e   : > { %v881_v54 = vmul.f32 1.442695, %v819_v46  ;;  %v1595_v55 = vpop.eup %1594  ;;  %1620 = vpow2.f32 %v879_v40  ;;  %v2198_v35 = vsub.s32 %v1014_v4, %v2083_v7  ;;  %v1031_v42 = vrot.slane %v2053_v16, %v2093_v26 }
 0x18f   : > { %v849_v60 = vmul.f32 1.442695, %v803_v49  ;;  %v1597_v62 = vpop.eup %1596  ;;  %1622 = vpow2.f32 %v847_v45  ;;  %v787_v2 = vmul.f32 0.6931472, %v1595_v55  ;;  %v934_v57 = vrot.slane %v2071_v50, %v2124_v20 }
 0x190   : > { %v2156_v3 = vpop.eup %1598  ;;  %1624 = vpow2.f32 %v881_v54  ;;  %v755_v6 = vmul.f32 0.6931472, %v1597_v62  ;;  %v1045_v44 = vrot.slane %v2075_v56, %v2128_v27  ;;  %v941_v37 = vrot.slane %v2089_v25, %v2128_v27 }
 0x191   : > { %v2162_v8 = vpop.eup %1600  ;;  %1626 = vpow2.f32 %v849_v60  ;;  %v820_v11 = vmul.f32 %v2031_v22, %v787_v2  ;;  %v1050_v45 = vrot.slane %v2108_v61, %v2132_v33  ;;  %v1036_v50 = vsel %vm928_vm0, %v1035_v23, %v1031_v42 }
 0x192   : > { %v2171_v12 = vpop.eup %1602  ;;  %v804_v17 = vmul.f32 %v2031_v22, %v755_v6  ;;  %v1040_v22 = vrot.slane %v2067_v41, %v2124_v20  ;;  %v922_v41 = vrot.slane %v2055_v19, %v2093_v26  ;;  %v948_v56 = vrot.slane %v2111_v1, %v2132_v33 }
 0x193   : > { %v2183_v21 = vpop.eup %1604  ;;  %v883_v30 = vmul.f32 1.442695, %v820_v11  ;;  %v1055_v20 = vrot.slane %v2118_v13, %v2137_v38  ;;  %v2218_v19 = vsub.s32 %v1021_v29, %v2083_v7  ;;  %v955_v27 = vrot.slane %v2121_v18, %v2137_v38 }
 0x194   : > { %v2191_v32 = vpop.eup %1606  ;;  %v851_v28 = vmul.f32 1.442695, %v804_v17  ;;  %v929_v25 = vsel %vm928_vm0, %v927_v34, %v922_v41  ;;  %v1041_v61 = vsel %vm935_vm1, %v1040_v22, %v1036_v50  ;;  %v1060_v46 = vrot.slane %v2134_v36, %v2153_v63 }
 0x195   : > { %v1609_v40 = vpop.eup %1608  ;;  %1628 = vpow2.f32 %v883_v30  ;;  %v936_v33 = vsel %vm935_vm1, %v934_v57, %v929_v25  ;;  %v1046_v13 = vsel %vm942_vm2, %v1045_v44, %v1041_v61  ;;  %v962_v7 = vrot.slane %v2139_v43, %v2153_v63 }
 0x196   : > { %v1611_v31 = vpop.eup %1610  ;;  %1630 = vpow2.f32 %v851_v28  ;;  %v1065_v47 = vrot.slane %v2146_v51, %v2159_v5  ;;  %v943_v49 = vsel %vm942_vm2, %v941_v37, %v936_v33  ;;  %v1051_v18 = vsel %vm949_vm3, %v1050_v45, %v1046_v13 }
 0x197   : > { %v1613_v16 = vpop.eup %1612  ;;  %v969_v36 = vrot.slane %v2156_v3, %v2159_v5  ;;  %v1070_v38 = vrot.slane %v2162_v8, %v2165_v9  ;;  %v950_v53 = vsel %vm949_vm3, %v948_v56, %v943_v49  ;;  %v1056_v54 = vsel %vm956_vm4, %v1055_v20, %v1051_v18 }
 0x198   : > { %v1615_v26 = vpop.eup %1614  ;;  %v976_v43 = vrot.slane %v2171_v12, %v2165_v9  ;;  %v1075_v51 = vrot.slane %v2183_v21, %v2168_v10  ;;  %v957_v58 = vsel %vm956_vm4, %v955_v27, %v950_v53  ;;  %v1061_v59 = vsel %vm963_vm5, %v1060_v46, %v1056_v54 }
 0x199   : > { %v1617_v1 = vpop.eup %1616  ;;  %v983_v60 = vrot.slane %v2191_v32, %v2168_v10  ;;  %v1080_v62 = vrot.slane %v1609_v40, %v2174_v39  ;;  %v964_v0 = vsel %vm963_vm5, %v962_v7, %v957_v58  ;;  %v1066_v2 = vsel %vm970_vm6, %v1065_v47, %v1061_v59 }
 0x19a   : > { %v1619_v48 = vpop.eup %1618  ;;  %v990_v3 = vrot.slane %v1611_v31, %v2174_v39  ;;  %v1085_v5 = vrot.slane %v1613_v16, %v2177_v14  ;;  %v971_v6 = vsel %vm970_vm6, %v969_v36, %v964_v0  ;;  %v1071_v8 = vsel %vm977_vm7, %v1070_v38, %v1066_v2 }
 0x19b   : > { %v1621_v52 = vpop.eup %1620  ;;  %v997_v9 = vrot.slane %v1615_v26, %v2177_v14  ;;  %v1090_v10 = vrot.slane %v1617_v1, %v2180_v15  ;;  %v978_v11 = vsel %vm977_vm7, %v976_v43, %v971_v6  ;;  %v1076_v12 = vsel %vm984_vm8, %v1075_v51, %v1071_v8 }
 0x19c   : > { %v1623_v55 = vpop.eup %1622  ;;  %v1004_v17 = vrot.slane %v1619_v48, %v2180_v15  ;;  %v1095_v21 = vrot.slane %v1621_v52, %v2188_v24  ;;  %v985_v39 = vsel %vm984_vm8, %v983_v60, %v978_v11  ;;  %v1081_v23 = vsel %vm991_vm9, %v1080_v62, %v1076_v12 }
 0x19d   : > { %v1625_v63 = vpop.eup %1624  ;;  %v1011_v29 = vrot.slane %v1623_v55, %v2188_v24  ;;  %v992_v14 = vsel %vm991_vm9, %v990_v3, %v985_v39  ;;  %v1086_v32 = vsel %vm998_vm10, %v1085_v5, %v1081_v23 }
 0x19e   : > { %v1627_v4 = vpop.eup %1626  ;;  %v1100_v30 = vrot.slane %v1625_v63, %v2198_v35  ;;  %v999_v15 = vsel %vm998_vm10, %v997_v9, %v992_v14  ;;  %v1091_v28 = vsel %vm1005_vm11, %v1090_v10, %v1086_v32 }
 0x19f   : > { %v1018_v34 = vrot.slane %v1627_v4, %v2198_v35  ;;  %v1006_v42 = vsel %vm1005_vm11, %v1004_v17, %v999_v15  ;;  %v1096_v24 = vsel %vm1012_vm12, %v1095_v21, %v1091_v28 }
 0x1a0   : > { %v1013_v44 = vsel %vm1012_vm12, %v1011_v29, %v1006_v42  ;;  %v1101_v31 = vsel %vm1019_vm13, %v1100_v30, %v1096_v24 }
 0x1a1   : > { %v1020_v41 = vsel %vm1019_vm13, %v1018_v34, %v1013_v44 }
 0x1a2   : > { %v1629_v22 = vpop.eup %1628 }
 0x1a3   : > { %v1631_v40 = vpop.eup %1630  ;;  %v1105_v57 = vrot.slane %v1629_v22, %v2218_v19 }
 0x1a4   : > { %v1025_v35 = vrot.slane %v1631_v40, %v2218_v19 }
 0x1a5   : > { %v1106_v37 = vsel %vm1026_vm14, %v1105_v57, %v1101_v31 }
 0x1a6   : > { %v1027_v45 = vsel %vm1026_vm14, %v1025_v35, %v1020_v41 }
 0x1a7   : > { %v1108_v16 = vsel %vm1107_vm15, %v1106_v37, %v1027_v45 }
 0x1a8   : > { %1110 = vst [vmem:[%s228_s27] sm:$0x3] %v1108_v16 }
 0x1a9 PF: > { %s1249_s12 = sshll.u32 %s1755_s16, 5  ;;  %s1127_s28 = sshll.u32 %s228_s27, 4  ;;  %s1128_s28 = int_to_ptr.vmem [resolvable:$true] %s1127_s28 }
 0x1aa   : > { %s1125_s23 = scalar_lea.hbm %s2336_s2, %s1249_s12  ;;  %s1112_s30 = scalar_lea.sflag [#allocation5], %s226_s26 }
 0x1ab   : > { %s1643_s0 = scalar_lea.vmem %s1128_s28, 32  ;;  %s1778_s5 = smov [#allocation8]  }
 0x1ac   : > { %p1644_p7 = scmp.ne.s32.totalorder %s1128_s28, %s1643_s0  ;;  %s1647_s3 = sshll.u32 %s1778_s5, 4  ;;  %s1648_s3 = int_to_ptr.vmem [resolvable:$false] %s1647_s3 }
 0x1ad   : > { %s1649_s18 = scalar_lea.vmem %s1648_s3, 64  ;;  %p1650_p0 = scmp.lt.s32.totalorder %s1128_s28, %s1648_s3 }
 0x1ae   : > { %p1645_p11 = pnand %p1644_p7, %p1882_p12  ;;  %p1651_p1 = scmp.lt.s32.totalorder %s1649_s18, %s1643_s0 }
 0x1b0   : > { %p1646_p13 = pneg %p1645_p11  ;;  %p1652_p2 = por %p1651_p1, %p1650_p0 }
 0x1b2   : > { %p1653_p5 = pnand %p1652_p2, %p1646_p13 }
 0x1b4   : > { %1656 = shalt.err (!%p1653_p5)
}
 0x1b5   : > { %s1657_s16 = scalar_lea.hbm %s1125_s23, 32  ;;  %s1661_s25 = scalar_lea.hbm %s2336_s2, 64 }
 0x1b6   : > { %p1658_p8 = scmp.ne.s32.totalorder %s1125_s23, %s1657_s16  ;;  %p1662_p3 = scmp.lt.s32.totalorder %s1125_s23, %s2336_s2 }
 0x1b7   : > { %p1663_p6 = scmp.lt.s32.totalorder %s1661_s25, %s1657_s16 }
 0x1b8   : > { %p1659_p9 = pnand %p1658_p8, %p1882_p12 }
 0x1b9   : > { %p1664_p7 = por %p1663_p6, %p1662_p3 }
 0x1ba   : > { %p1660_p10 = pneg %p1659_p9 }
 0x1bc   : > { %p1665_p11 = pnand %p1664_p7, %p1660_p10 }
 0x1be   : > { %1668 = shalt.err (!%p1665_p11)
}
 0x1bf   : > { %1266 = dma.vmem_to_hbm [thread:$0]  (%p1882_p12), %s1128_s28, 32, %s1125_s23, %s1112_s30  }
 0x1c0 PF: > { %p1278_p13 = scmp.ge.s32.totalorder %s1767_s19, 2  ;;  %s1139_s27 = sand.u32 1, %s1727_s9  }
 0x1c1   : > { %s1140_s29 = scalar_lea.sflag [#allocation5], %s1139_s27 }
 0x1c2   : > { %p1273_p0 = pnand %p1278_p13, %p1896_p4 }
 0x1c4   : > { %p1274_p1 = pneg %p1273_p0 }
 0x1c6   : > { %1722 = dma.done.wait (%p1274_p1), %s1140_s29, 32  }
 0x1c7   : > { %1724 = vsyncadd (%p1274_p1), %s1140_s29, 4294967264  ;;  %s19_s19 = sadd.s32 1, %s1767_s19   ;;  %s2353_s15 = sld [smem:[#allocation18_spill]] }
 0x1c8   : > { %p16_p2 = scmp.ge.s32.totalorder %s19_s19, 8   ;;  %s2354_s4 = sld [smem:[#allocation19_spill]] }
 0x1c9   : > { %s2355_s16 = sld [smem:[#allocation15_spill]]  ;;  %s2358_s9 = smov %s1731_s10 }
 0x1ca   : > { %s2356_s21 = sld [smem:[#allocation16_spill]]  ;;  %s2359_s10 = smov %s1735_s11 }
 0x1cb   : > { %s2357_s18 = sld [smem:[#allocation17_spill]]  ;;  %s2361_s12 = smov %s1743_s13 }
 0x1cc   : > { %s2362_s13 = smov %s1747_s14  ;;  %18 = sbr.rel (!%p16_p2) target bundleno = 12 (0xc), region = 91 }
 0x1cd   : > { %s2360_s11 = smov %s2353_s15  ;;  %s2364_s15 = smov %s1759_s17 }
 0x1ce   : > { %s2363_s14 = smov %s2354_s4 }
 0x1d0   : > { %s2365_s17 = smov %s2356_s21 }
 0x1d1   :  { %1145 = vsyncpa [#allocation4], 1 }
 0x1d2   :  { %1147 = vsyncpa [#allocation4 + $0x1], 1 }
 0x1d3   :  { %1148 = vsyncpa [#allocation5], 1 }
 0x1d4   :  { %1150 = vsyncpa [#allocation5 + $0x1], 1 }
 0x1d5   :  { %1151 = vsyncpa [#allocation6], 1 }
 0x1d6   :  { %1153 = vsyncpa [#allocation6 + $0x1], 1 }

</bundles_post_ra>
